<compile_context>
chip_gen: v5e
topology: v5e:2x2
jax: 0.10.0
libtpu: 0.0.40
codegen_flags: <defaults>
</compile_context>

<pallas_src>
import functools

import jax
import jax.numpy as jnp
from jax.experimental import pallas as pl
from jax.experimental.pallas import tpu as pltpu

# -------------------- config (small, consistent with the module) -----------
ZE = 32        # args.ze  (input latent size)
Z = 16         # args.z   (per-head output size; linear3 emits 8*Z)
HID = 512      # hidden width (fixed by the module)
BATCH = 8      # demo batch size (kernel handles any flattened batch)
BN_EPS = 1e-5  # PyTorch BatchNorm1d default


# -------------------------- Pallas kernel ----------------------------------
def encoderz_kernel(x_ref, noise_ref,
                    w1_ref, g1_ref, be1_ref,
                    w2_ref, g2_ref, be2_ref,
                    w3_ref, b3_ref,
                    out_ref):
    inv_b = jnp.float32(1.0 / x_ref.shape[0])        # static batch size

    # noise injection:  x = N(0, 0.01) + x
    x = x_ref[...] + noise_ref[...]                   # (B, ze)

    def bn_relu(h, gamma, beta):
        # single-pass batch stats (biased variance, matches BN training mode)
        mean = jnp.sum(h, axis=0, keepdims=True) * inv_b        # (1, 512)
        ex2 = jnp.sum(h * h, axis=0, keepdims=True) * inv_b     # (1, 512)
        var = ex2 - mean * mean
        scale = gamma * jax.lax.rsqrt(var + BN_EPS)              # (1, 512)
        shift = beta - mean * scale                              # (1, 512)
        # fused affine + ReLU: one FMA + one max over the (B, 512) tensor
        return jnp.maximum(h * scale + shift, 0.0)

    # ---- linear1 (+b1 dropped: cancelled by bn1) + bn1 + relu ----
    h = jnp.dot(x, w1_ref[...], preferred_element_type=jnp.float32)
    h = bn_relu(h, g1_ref[...], be1_ref[...])                    # (B, 512)

    # ---- linear2 (+b2 dropped: cancelled by bn2) + bn2 + relu ----
    h = jnp.dot(h, w2_ref[...], preferred_element_type=jnp.float32)
    h = bn_relu(h, g2_ref[...], be2_ref[...])                    # (B, 512)

    # ---- linear3 (bias kept: no BN after it) ----
    out_ref[...] = (jnp.dot(h, w3_ref[...], preferred_element_type=jnp.float32)
                    + b3_ref[...])                               # (B, 8*z)


@jax.jit
def encoderz_forward(x, noise, params):
    """x, noise: (N, ze) float32 (caller flattens like x.view(-1, ze))."""
    B = x.shape[0]
    vmem = pl.BlockSpec(memory_space=pltpu.MemorySpace.VMEM)
    n_inputs = 10

    # advisory cost hint for the XLA scheduler
    flops = int(2 * B * (ZE * HID + HID * HID + HID * 8 * Z) + 12 * B * HID)
    bytes_accessed = int(4 * (2 * B * ZE               # x + noise
                              + ZE * HID + HID * HID + HID * 8 * Z   # weights
                              + 4 * HID + 8 * Z        # bn params + b3
                              + B * 8 * Z))            # output

    out = pl.pallas_call(
        encoderz_kernel,
        out_shape=jax.ShapeDtypeStruct((B, 8 * Z), jnp.float32),
        in_specs=[vmem] * n_inputs,
        out_specs=vmem,
        compiler_params=pltpu.CompilerParams(vmem_limit_bytes=8 << 20),
        cost_estimate=pl.CostEstimate(flops=flops,
                                      transcendentals=2 * HID,
                                      bytes_accessed=bytes_accessed),
    )(x, noise,
      params["w1"], params["g1"], params["be1"],
      params["w2"], params["g2"], params["be2"],
      params["w3"], params["b3"])

    # x.view(-1, 8, z)  ->  split into the 8 heads (interface-mandated)
    out = out.reshape(B, 8, Z)
    return tuple(out[:, i] for i in range(8))


# -------------------------- param init (deterministic) ---------------------
def init_params(key):
    ks = jax.random.split(key, 3)

    def linear(kw, fan_in, fan_out):
        # PyTorch default: U(-1/sqrt(fan_in), 1/sqrt(fan_in)); stored as [in, out]
        bound = 1.0 / jnp.sqrt(fan_in)
        w = jax.random.uniform(kw, (fan_in, fan_out), jnp.float32, -bound, bound)
        b = jax.random.uniform(jax.random.fold_in(kw, 1), (1, fan_out),
                               jnp.float32, -bound, bound)
        return w, b

    w1, b1 = linear(ks[0], ZE, HID)
    w2, b2 = linear(ks[1], HID, HID)
    w3, b3 = linear(ks[2], HID, 8 * Z)
    return {
        # b1 / b2 are kept only for the reference: they are mathematically
        # cancelled by the following BatchNorm, so the kernel never reads them.
        "w1": w1, "b1": b1,
        "g1": jnp.ones((1, HID), jnp.float32),    # BatchNorm1d weight init = 1
        "be1": jnp.zeros((1, HID), jnp.float32),  # BatchNorm1d bias init = 0
        "w2": w2, "b2": b2,
        "g2": jnp.ones((1, HID), jnp.float32),
        "be2": jnp.zeros((1, HID), jnp.float32),
        "w3": w3, "b3": b3,
    }


# -------------------------- pure-JAX reference ------------------------------
def reference_forward(x, noise, p):
    """Faithful transcription of the PyTorch forward (biases included)."""
    h = x + noise
    h = h @ p["w1"] + p["b1"]
    m, v = h.mean(0, keepdims=True), h.var(0, keepdims=True)
    h = jnp.maximum((h - m) / jnp.sqrt(v + BN_EPS) * p["g1"] + p["be1"], 0.0)
    h = h @ p["w2"] + p["b2"]
    m, v = h.mean(0, keepdims=True), h.var(0, keepdims=True)
    h = jnp.maximum((h - m) / jnp.sqrt(v + BN_EPS) * p["g2"] + p["be2"], 0.0)
    out = (h @ p["w3"] + p["b3"]).reshape(-1, 8, Z)
    return tuple(out[:, i] for i in range(8))


if __name__ == "__main__":
    key = jax.random.PRNGKey(0)
    kx, kn, kp = jax.random.split(key, 3)

    x = jax.random.normal(kx, (BATCH, ZE), jnp.float32)       # x.view(-1, ze)
    # torch.zeros_like(x).normal_(0, 0.01): same distribution, JAX RNG stream
    noise = 0.01 * jax.random.normal(kn, (BATCH, ZE), jnp.float32)
    params = init_params(kp)

    outs = encoderz_forward(x, noise, params)
    outs = jax.block_until_ready(outs)

    refs = reference_forward(x, noise, params)
    for o, r in zip(outs, refs):
        assert o.shape == (BATCH, Z)
        assert jnp.allclose(o, r, atol=1e-3, rtol=1e-3), \
            float(jnp.max(jnp.abs(o - r)))

    print("KERNEL_OK")
</pallas_src>

<mosaic_0001>
module attributes {stable_mosaic.version = 11 : i64} {
  func.func @encoderz_kernel(%arg0: memref<8x32xf32, #tpu.memory_space<vmem>>, %arg1: memref<8x32xf32, #tpu.memory_space<vmem>>, %arg2: memref<32x512xf32, #tpu.memory_space<vmem>>, %arg3: memref<1x512xf32, #tpu.memory_space<vmem>>, %arg4: memref<1x512xf32, #tpu.memory_space<vmem>>, %arg5: memref<512x512xf32, #tpu.memory_space<vmem>>, %arg6: memref<1x512xf32, #tpu.memory_space<vmem>>, %arg7: memref<1x512xf32, #tpu.memory_space<vmem>>, %arg8: memref<512x128xf32, #tpu.memory_space<vmem>>, %arg9: memref<1x128xf32, #tpu.memory_space<vmem>>, %arg10: memref<8x128xf32, #tpu.memory_space<vmem>>) attributes {dimension_semantics = [], scalar_prefetch = 0 : i64, scratch_operands = 0 : i64, tpu.core_type = #tpu.core_type<tc>} {
    %c0 = arith.constant 0 : index
    %c0_0 = arith.constant 0 : index
    %0 = vector.load %arg0[%c0, %c0_0] : memref<8x32xf32, #tpu.memory_space<vmem>>, vector<8x32xf32>
    %c0_1 = arith.constant 0 : index
    %c0_2 = arith.constant 0 : index
    %1 = vector.load %arg1[%c0_1, %c0_2] : memref<8x32xf32, #tpu.memory_space<vmem>>, vector<8x32xf32>
    %2 = arith.addf %0, %1 : vector<8x32xf32>
    %c0_3 = arith.constant 0 : index
    %c0_4 = arith.constant 0 : index
    %3 = vector.load %arg2[%c0_3, %c0_4] : memref<32x512xf32, #tpu.memory_space<vmem>>, vector<32x512xf32>
    %cst = arith.constant dense<0.000000e+00> : vector<8x512xf32>
    %4 = tpu.matmul %2, %3, %cst {dimension_numbers = #tpu.dot_dimension_numbers<[1], [0], [0], [1], [0, 0, 1, 1], [], []>} : vector<8x32xf32>, vector<32x512xf32>, vector<8x512xf32> -> vector<8x512xf32>
    %c0_5 = arith.constant 0 : index
    %c0_6 = arith.constant 0 : index
    %5 = vector.load %arg3[%c0_5, %c0_6] : memref<1x512xf32, #tpu.memory_space<vmem>>, vector<1x512xf32>
    %c0_7 = arith.constant 0 : index
    %c0_8 = arith.constant 0 : index
    %6 = vector.load %arg4[%c0_7, %c0_8] : memref<1x512xf32, #tpu.memory_space<vmem>>, vector<1x512xf32>
    %cst_9 = arith.constant dense<0.000000e+00> : vector<512xf32>
    %7 = vector.multi_reduction <add>, %4, %cst_9 [0] : vector<8x512xf32> to vector<512xf32>
    %8 = vector.shape_cast %7 : vector<512xf32> to vector<1x512xf32>
    %cst_10 = arith.constant 1.250000e-01 : f32
    %9 = vector.broadcast %cst_10 : f32 to vector<1x512xf32>
    %10 = arith.mulf %8, %9 : vector<1x512xf32>
    %11 = arith.mulf %4, %4 : vector<8x512xf32>
    %cst_11 = arith.constant dense<0.000000e+00> : vector<512xf32>
    %12 = vector.multi_reduction <add>, %11, %cst_11 [0] : vector<8x512xf32> to vector<512xf32>
    %13 = vector.shape_cast %12 : vector<512xf32> to vector<1x512xf32>
    %cst_12 = arith.constant 1.250000e-01 : f32
    %14 = vector.broadcast %cst_12 : f32 to vector<1x512xf32>
    %15 = arith.mulf %13, %14 : vector<1x512xf32>
    %16 = arith.mulf %10, %10 : vector<1x512xf32>
    %17 = arith.subf %15, %16 : vector<1x512xf32>
    %cst_13 = arith.constant 9.99999974E-6 : f32
    %18 = vector.broadcast %cst_13 : f32 to vector<1x512xf32>
    %19 = arith.addf %17, %18 : vector<1x512xf32>
    %20 = math.rsqrt %19 : vector<1x512xf32>
    %21 = arith.mulf %5, %20 : vector<1x512xf32>
    %22 = arith.mulf %10, %21 : vector<1x512xf32>
    %23 = arith.subf %6, %22 : vector<1x512xf32>
    %24 = vector.broadcast %21 : vector<1x512xf32> to vector<8x512xf32>
    %25 = arith.mulf %4, %24 : vector<8x512xf32>
    %26 = vector.broadcast %23 : vector<1x512xf32> to vector<8x512xf32>
    %27 = arith.addf %25, %26 : vector<8x512xf32>
    %cst_14 = arith.constant 0.000000e+00 : f32
    %28 = vector.broadcast %cst_14 : f32 to vector<8x512xf32>
    %29 = arith.maximumf %27, %28 : vector<8x512xf32>
    %c0_15 = arith.constant 0 : index
    %c0_16 = arith.constant 0 : index
    %30 = vector.load %arg5[%c0_15, %c0_16] : memref<512x512xf32, #tpu.memory_space<vmem>>, vector<512x512xf32>
    %cst_17 = arith.constant dense<0.000000e+00> : vector<8x512xf32>
    %31 = tpu.matmul %29, %30, %cst_17 {dimension_numbers = #tpu.dot_dimension_numbers<[1], [0], [0], [1], [0, 0, 1, 1], [], []>} : vector<8x512xf32>, vector<512x512xf32>, vector<8x512xf32> -> vector<8x512xf32>
    %c0_18 = arith.constant 0 : index
    %c0_19 = arith.constant 0 : index
    %32 = vector.load %arg6[%c0_18, %c0_19] : memref<1x512xf32, #tpu.memory_space<vmem>>, vector<1x512xf32>
    %c0_20 = arith.constant 0 : index
    %c0_21 = arith.constant 0 : index
    %33 = vector.load %arg7[%c0_20, %c0_21] : memref<1x512xf32, #tpu.memory_space<vmem>>, vector<1x512xf32>
    %cst_22 = arith.constant dense<0.000000e+00> : vector<512xf32>
    %34 = vector.multi_reduction <add>, %31, %cst_22 [0] : vector<8x512xf32> to vector<512xf32>
    %35 = vector.shape_cast %34 : vector<512xf32> to vector<1x512xf32>
    %cst_23 = arith.constant 1.250000e-01 : f32
    %36 = vector.broadcast %cst_23 : f32 to vector<1x512xf32>
    %37 = arith.mulf %35, %36 : vector<1x512xf32>
    %38 = arith.mulf %31, %31 : vector<8x512xf32>
    %cst_24 = arith.constant dense<0.000000e+00> : vector<512xf32>
    %39 = vector.multi_reduction <add>, %38, %cst_24 [0] : vector<8x512xf32> to vector<512xf32>
    %40 = vector.shape_cast %39 : vector<512xf32> to vector<1x512xf32>
    %cst_25 = arith.constant 1.250000e-01 : f32
    %41 = vector.broadcast %cst_25 : f32 to vector<1x512xf32>
    %42 = arith.mulf %40, %41 : vector<1x512xf32>
    %43 = arith.mulf %37, %37 : vector<1x512xf32>
    %44 = arith.subf %42, %43 : vector<1x512xf32>
    %cst_26 = arith.constant 9.99999974E-6 : f32
    %45 = vector.broadcast %cst_26 : f32 to vector<1x512xf32>
    %46 = arith.addf %44, %45 : vector<1x512xf32>
    %47 = math.rsqrt %46 : vector<1x512xf32>
    %48 = arith.mulf %32, %47 : vector<1x512xf32>
    %49 = arith.mulf %37, %48 : vector<1x512xf32>
    %50 = arith.subf %33, %49 : vector<1x512xf32>
    %51 = vector.broadcast %48 : vector<1x512xf32> to vector<8x512xf32>
    %52 = arith.mulf %31, %51 : vector<8x512xf32>
    %53 = vector.broadcast %50 : vector<1x512xf32> to vector<8x512xf32>
    %54 = arith.addf %52, %53 : vector<8x512xf32>
    %cst_27 = arith.constant 0.000000e+00 : f32
    %55 = vector.broadcast %cst_27 : f32 to vector<8x512xf32>
    %56 = arith.maximumf %54, %55 : vector<8x512xf32>
    %c0_28 = arith.constant 0 : index
    %c0_29 = arith.constant 0 : index
    %57 = vector.load %arg8[%c0_28, %c0_29] : memref<512x128xf32, #tpu.memory_space<vmem>>, vector<512x128xf32>
    %cst_30 = arith.constant dense<0.000000e+00> : vector<8x128xf32>
    %58 = tpu.matmul %56, %57, %cst_30 {dimension_numbers = #tpu.dot_dimension_numbers<[1], [0], [0], [1], [0, 0, 1, 1], [], []>} : vector<8x512xf32>, vector<512x128xf32>, vector<8x128xf32> -> vector<8x128xf32>
    %c0_31 = arith.constant 0 : index
    %c0_32 = arith.constant 0 : index
    %59 = vector.load %arg9[%c0_31, %c0_32] : memref<1x128xf32, #tpu.memory_space<vmem>>, vector<1x128xf32>
    %60 = vector.broadcast %59 : vector<1x128xf32> to vector<8x128xf32>
    %61 = arith.addf %58, %60 : vector<8x128xf32>
    %c0_33 = arith.constant 0 : index
    %c0_34 = arith.constant 0 : index
    %62 = vector.load %arg10[%c0_33, %c0_34] : memref<8x128xf32, #tpu.memory_space<vmem>>, vector<8x128xf32>
    tpu.vector_store %arg10[%c0_33, %c0_34], %61 {strides = array<i32>} : memref<8x128xf32, #tpu.memory_space<vmem>>, vector<8x128xf32>,
    return
  }
}

</mosaic_0001>

<bundles_post_ra>
// kernel: encoderz_forward.1
= control target key start
LH: loop header
LB: loop body
LE: loop exit
PB: predicated region body
PF: predicated region fallthrough
CT: control target
= control target key end

     0   :  { %15 = vsyncpa [#allocation3], 0  ;;  %s1915_s0 = inlined_call_operand.hbm [shape: f32[8,32], index: 0, kind: input, shape index: {}]   ;;  %s1916_s1 = inlined_call_operand.hbm [shape: f32[8,32], index: 1, kind: input, shape index: {}]   ;;  %s1917_s2 = inlined_call_operand.hbm [shape: f32[32,512], index: 2, kind: input, shape index: {}]   ;;  %s1918_s3 = inlined_call_operand.vmem [shape: f32[1,512], index: 3, kind: input, shape index: {}]   ;;  %s1919_s4 = inlined_call_operand.hbm [shape: f32[1,512], index: 4, kind: input, shape index: {}]   ;;  %s1920_s5 = inlined_call_operand.hbm [shape: f32[512,512], index: 5, kind: input, shape index: {}]   ;;  %s1921_s6 = inlined_call_operand.hbm [shape: f32[1,512], index: 6, kind: input, shape index: {}]   ;;  %s1922_s7 = inlined_call_operand.hbm [shape: f32[1,512], index: 7, kind: input, shape index: {}]   ;;  %s1923_s8 = inlined_call_operand.hbm [shape: f32[512,128], index: 8, kind: input, shape index: {}]   ;;  %s1924_s9 = inlined_call_operand.hbm [shape: f32[1,128], index: 9, kind: input, shape index: {}]   ;;  %s1925_s10 = inlined_call_operand.vmem [shape: f32[8,128], index: 10, kind: output, shape index: {}]  }
   0x1   :  { %16 = vsyncpa [#allocation5], 0 }
   0x2   :  { %17 = vsyncpa [#allocation8], 0 }
   0x3   :  { %18 = vsyncpa [#allocation11], 0  ;;  %s36_s15 = sshll.u32 %s1916_s1, 4  ;;  %s37_s15 = int_to_ptr.hbm [resolvable:$true] %s36_s15 }
   0x4   :  { %19 = vsyncpa [#allocation14], 0  ;;  %s1607_s16 = smov [#allocation4]   ;;  %s62_s20 = sshll.u32 %s1919_s4, 4  ;;  %s63_s20 = int_to_ptr.hbm [resolvable:$true] %s62_s20 }
   0x5   :  { %s38_s17 = sshll.u32 %s1607_s16, 4  ;;  %s1608_s21 = smov [#allocation7]   ;;  %s39_s17 = int_to_ptr.vmem [resolvable:$true] %s38_s17 }
   0x6   :  { %41 = dma.hbm_to_vmem [thread:$0]  %s37_s15, 128, %s39_s17, [#allocation5]  }
   0x7   :  { %s64_s22 = sshll.u32 %s1608_s21, 4  ;;  %s86_s25 = sshll.u32 %s1921_s6, 4  ;;  %s65_s22 = int_to_ptr.vmem [resolvable:$true] %s64_s22  ;;  %s87_s25 = int_to_ptr.hbm [resolvable:$true] %s86_s25 }
   0x8   :  { %67 = dma.hbm_to_vmem [thread:$0]  %s63_s20, 64, %s65_s22, [#allocation8]  }
   0x9   :  { %s107_s27 = sshll.u32 %s1923_s8, 4  ;;  %s1609_s28 = smov [#allocation10]   ;;  %s108_s27 = int_to_ptr.hbm [resolvable:$true] %s107_s27 }
   0xa   :  { %s88_s29 = sshll.u32 %s1609_s28, 4  ;;  %s1610_s4 = smov [#allocation13]   ;;  %s89_s29 = int_to_ptr.vmem [resolvable:$true] %s88_s29 }
   0xb   :  { %91 = dma.hbm_to_vmem [thread:$0]  %s87_s25, 64, %s89_s29, [#allocation11]  }
   0xc   :  { %s109_s30 = sshll.u32 %s1610_s4, 4  ;;  %s1611_s11 = smov 128   ;;  %s110_s30 = int_to_ptr.vmem [resolvable:$true] %s109_s30 }
   0xd   :  { %s1612_s12 = smov 8   ;;  %s25_s14 = sshll.u32 %s1915_s0, 4  ;;  %s26_s14 = int_to_ptr.hbm [resolvable:$true] %s25_s14 }
   0xe   :  { %115 = dma.hbm_to_vmem [thread:$0]  %s108_s27, 8192, %s110_s30, [#allocation14], %s1611_s11, %s1611_s11, %s1612_s12  }
   0xf   :  { %s1613_s15 = smov [#allocation2]   ;;  %s46_s18 = sshll.u32 %s1917_s2, 4  ;;  %s47_s18 = int_to_ptr.hbm [resolvable:$true] %s46_s18 }
  0x10   :  { %s27_s16 = sshll.u32 %s1613_s15, 4  ;;  %s1614_s19 = smov [#allocation6]   ;;  %s28_s16 = int_to_ptr.vmem [resolvable:$true] %s27_s16 }
  0x11   :  { %30 = dma.hbm_to_vmem [thread:$0]  %s26_s14, 128, %s28_s16, [#allocation3]  }
  0x12   :  { %s48_s20 = sshll.u32 %s1614_s19, 4  ;;  %s1615_s21 = smov 512   ;;  %s49_s20 = int_to_ptr.vmem [resolvable:$true] %s48_s20 }
  0x13   :  { %s1616_s22 = smov 32   ;;  %s72_s0 = sshll.u32 %s1920_s5, 4  ;;  %s73_s0 = int_to_ptr.hbm [resolvable:$true] %s72_s0 }
  0x14   :  { %54 = dma.hbm_to_vmem [thread:$0]  %s47_s18, 2048, %s49_s20, [#allocation5], %s1615_s21, %s1615_s21, %s1616_s22  }
  0x15   :  { %s1617_s25 = smov [#allocation9]   ;;  %s97_s2 = sshll.u32 %s1922_s7, 4  ;;  %s98_s2 = int_to_ptr.hbm [resolvable:$true] %s97_s2 }
  0x16   :  { %s74_s1 = sshll.u32 %s1617_s25, 4  ;;  %s1618_s28 = smov [#allocation12]   ;;  %s75_s1 = int_to_ptr.vmem [resolvable:$true] %s74_s1 }
  0x17   :  { %80 = dma.hbm_to_vmem [thread:$0]  %s73_s0, 32768, %s75_s1, [#allocation8], %s1615_s21, %s1615_s21, %s1616_s22  }
  0x18   :  { %s99_s29 = sshll.u32 %s1618_s28, 4  ;;  %s121_s11 = sshll.u32 %s1924_s9, 4  ;;  %s100_s29 = int_to_ptr.vmem [resolvable:$true] %s99_s29  ;;  %s122_s11 = int_to_ptr.hbm [resolvable:$true] %s121_s11 }
  0x19   :  { %102 = dma.hbm_to_vmem [thread:$0]  %s98_s2, 64, %s100_s29, [#allocation11]  }
  0x1a   :  { %s1619_s5 = smov [#allocation15]  }
  0x1b   :  { %s123_s12 = sshll.u32 %s1619_s5, 4  ;;  %s124_s12 = int_to_ptr.vmem [resolvable:$true] %s123_s12 }
  0x1c   :  { %126 = dma.hbm_to_vmem [thread:$0]  %s122_s11, 16, %s124_s12, [#allocation14]  }
  0x1d   :  { %1597 = dma.done.wait [#allocation3], 128  }
  0x1e   :  { %1598 = vsyncadd [#allocation3], 4294967168 }
  0x1f   :  { %1599 = dma.done.wait [#allocation5], 2176  }
  0x20   :  { %1600 = vsyncadd [#allocation5], 4294965120 }
  0x21   :  { %1601 = dma.done.wait [#allocation8], 32832  }
  0x22   :  { %1602 = vsyncadd [#allocation8], 4294934464 }
  0x23   :  { %1603 = dma.done.wait [#allocation11], 128  }
  0x24   :  { %1604 = vsyncadd [#allocation11], 4294967168 }
  0x25   :  { %1605 = dma.done.wait [#allocation14], 8208  }
  0x26   :  { %1606 = vsyncadd [#allocation14], 4294959088  ;;  %v178_v0 = vld [vmem:[#allocation6 + $0x60] sm:$0xff]  ;;  %v179_v1 = vld [vmem:[#allocation6 + $0x68] sm:$0xff]  ;;  %vm182_vm0 = vcmask 261120   ;;  %vm387_vm11 = vcmask 1040384  }
  0x27   :  { %v180_v2 = vld [vmem:[#allocation6 + $0x70] sm:$0xff]  ;;  %198 = vmatpush.msra.mxu0 %v178_v0  ;;  %218 = vmatpush.msra.mxu1 %v179_v1  ;;  %v181_v3 = vld [vmem:[#allocation6 + $0x78] sm:$0xff]  ;;  %v174_v4 = vld [vmem:[#allocation6 + $0x40] sm:$0xff]  ;;  %vm389_vm13 = vcmask 1042434   ;;  %vm391_vm15 = vcmask 1041408  }
  0x28   :  { %v175_v5 = vld [vmem:[#allocation6 + $0x48] sm:$0xff]  ;;  %238 = vmatpush.msra.mxu2 %v180_v2  ;;  %258 = vmatpush.msra.mxu3 %v181_v3  ;;  %v176_v6 = vld [vmem:[#allocation6 + $0x50] sm:$0xff]  ;;  %v177_v7 = vld [vmem:[#allocation6 + $0x58] sm:$0xff] }
  0x29   :  { %v170_v8 = vld [vmem:[#allocation6 + $0x20] sm:$0xff]  ;;  %199 = vmatpush.msra.mxu0 %v174_v4  ;;  %219 = vmatpush.msra.mxu1 %v175_v5  ;;  %v171_v9 = vld [vmem:[#allocation6 + $0x28] sm:$0xff]  ;;  %v172_v10 = vld [vmem:[#allocation6 + $0x30] sm:$0xff] }
  0x2a   :  { %v173_v11 = vld [vmem:[#allocation6 + $0x38] sm:$0xff]  ;;  %239 = vmatpush.msra.mxu2 %v176_v6  ;;  %259 = vmatpush.msra.mxu3 %v177_v7  ;;  %v166_v12 = vld [vmem:[#allocation6] sm:$0xff]  ;;  %v167_v13 = vld [vmem:[#allocation6 + $0x8] sm:$0xff] }
  0x2b   :  { %v168_v14 = vld [vmem:[#allocation6 + $0x10] sm:$0xff]  ;;  %200 = vmatpush.msra.mxu0 %v170_v8  ;;  %220 = vmatpush.msra.mxu1 %v171_v9  ;;  %v169_v15 = vld [vmem:[#allocation6 + $0x18] sm:$0xff]  ;;  %v501_v19 = vld [vmem:[#allocation9 + $0x1e0] sm:$0xff] }
  0x2c   :  { %v163_v16 = vld [vmem:[#allocation2] sm:$0xff]  ;;  %v164_v17 = vld [vmem:[#allocation4] sm:$0xff]  ;;  %240 = vmatpush.msra.mxu2 %v172_v10  ;;  %260 = vmatpush.msra.mxu3 %v173_v11  ;;  %v565_v20 = vld [vmem:[#allocation9 + $0x3e0] sm:$0xff] }
  0x2d   :  { %v165_v18 = vadd.f32 %v164_v17, %v163_v16  ;;  %201 = vmatpush.msra.mxu0 %v166_v12  ;;  %221 = vmatpush.msra.mxu1 %v167_v13  ;;  %v629_v21 = vld [vmem:[#allocation9 + $0x5e0] sm:$0xff] }
  0x2e   :  { %241 = vmatpush.msra.mxu2 %v168_v14  ;;  %261 = vmatpush.msra.mxu3 %v169_v15  ;;  %v693_v22 = vld [vmem:[#allocation9 + $0x7e0] sm:$0xff] }
  0x2f   :  { %1347 = vmatmul.msk.f32.vlgmr.msra.gmra.mxu0 %vm182_vm0, %v165_v18  ;;  %1348 = vmatmul.msk.f32.vlgmr.msra.gmra.mxu1 %vm182_vm0, %v165_v18  ;;  %v497_v23 = vld [vmem:[#allocation9 + $0x1c0] sm:$0xff] }
  0x30   :  { %1349 = vmatmul.msk.f32.vlgmr.msra.gmra.mxu2 %vm182_vm0, %v165_v18  ;;  %1350 = vmatmul.msk.f32.vlgmr.msra.gmra.mxu3 %vm182_vm0, %v165_v18  ;;  %v561_v24 = vld [vmem:[#allocation9 + $0x3c0] sm:$0xff] }
  0x31   :  { %697 = vmatpush.msrb.mxu0 %v501_v19  ;;  %717 = vmatpush.msrb.mxu1 %v565_v20  ;;  %v625_v25 = vld [vmem:[#allocation9 + $0x5c0] sm:$0xff] }
  0x32   :  { %737 = vmatpush.msrb.mxu2 %v629_v21  ;;  %757 = vmatpush.msrb.mxu3 %v693_v22  ;;  %v689_v26 = vld [vmem:[#allocation9 + $0x7c0] sm:$0xff] }
  0x33   :  { %698 = vmatpush.msrb.mxu0 %v497_v23  ;;  %718 = vmatpush.msrb.mxu1 %v561_v24  ;;  %v493_v27 = vld [vmem:[#allocation9 + $0x1a0] sm:$0xff] }
  0x34   :  { %738 = vmatpush.msrb.mxu2 %v625_v25  ;;  %758 = vmatpush.msrb.mxu3 %v689_v26  ;;  %v557_v28 = vld [vmem:[#allocation9 + $0x3a0] sm:$0xff] }
  0x35   :  { %v621_v29 = vld [vmem:[#allocation9 + $0x5a0] sm:$0xff]  ;;  %699 = vmatpush.msrb.mxu0 %v493_v27  ;;  %719 = vmatpush.msrb.mxu1 %v557_v28 }
  0x36   :  { %v685_v30 = vld [vmem:[#allocation9 + $0x7a0] sm:$0xff]  ;;  %739 = vmatpush.msrb.mxu2 %v621_v29 }
  0x37   :  { %759 = vmatpush.msrb.mxu3 %v685_v30  ;;  %v489_v31 = vld [vmem:[#allocation9 + $0x180] sm:$0xff] }
  0x38   :  { %v553_v32 = vld [vmem:[#allocation9 + $0x380] sm:$0xff]  ;;  %700 = vmatpush.msrb.mxu0 %v489_v31 }
  0x39   :  { %v617_v33 = vld [vmem:[#allocation9 + $0x580] sm:$0xff]  ;;  %720 = vmatpush.msrb.mxu1 %v553_v32 }
  0x3a   :  { %v681_v34 = vld [vmem:[#allocation9 + $0x780] sm:$0xff]  ;;  %740 = vmatpush.msrb.mxu2 %v617_v33  ;;  %v502_v33 = vld [vmem:[#allocation9 + $0x1e8] sm:$0xff] }
  0x3b   :  { %760 = vmatpush.msrb.mxu3 %v681_v34  ;;  %v485_v35 = vld [vmem:[#allocation9 + $0x160] sm:$0xff]  ;;  %v566_v34 = vld [vmem:[#allocation9 + $0x3e8] sm:$0xff] }
  0x3c   :  { %v549_v36 = vld [vmem:[#allocation9 + $0x360] sm:$0xff]  ;;  %701 = vmatpush.msrb.mxu0 %v485_v35 }
  0x3d   :  { %v613_v37 = vld [vmem:[#allocation9 + $0x560] sm:$0xff]  ;;  %721 = vmatpush.msrb.mxu1 %v549_v36 }
  0x3e   :  { %v677_v38 = vld [vmem:[#allocation9 + $0x760] sm:$0xff]  ;;  %741 = vmatpush.msrb.mxu2 %v613_v37 }
  0x3f   :  { %761 = vmatpush.msrb.mxu3 %v677_v38  ;;  %v481_v39 = vld [vmem:[#allocation9 + $0x140] sm:$0xff] }
  0x40   :  { %v545_v40 = vld [vmem:[#allocation9 + $0x340] sm:$0xff]  ;;  %702 = vmatpush.msrb.mxu0 %v481_v39 }
  0x41   :  { %v609_v41 = vld [vmem:[#allocation9 + $0x540] sm:$0xff]  ;;  %722 = vmatpush.msrb.mxu1 %v545_v40 }
  0x42   :  { %v673_v42 = vld [vmem:[#allocation9 + $0x740] sm:$0xff]  ;;  %742 = vmatpush.msrb.mxu2 %v609_v41  ;;  %v630_v41 = vld [vmem:[#allocation9 + $0x5e8] sm:$0xff] }
  0x43   :  { %762 = vmatpush.msrb.mxu3 %v673_v42  ;;  %v477_v43 = vld [vmem:[#allocation9 + $0x120] sm:$0xff]  ;;  %v694_v42 = vld [vmem:[#allocation9 + $0x7e8] sm:$0xff] }
  0x44   :  { %v541_v44 = vld [vmem:[#allocation9 + $0x320] sm:$0xff]  ;;  %703 = vmatpush.msrb.mxu0 %v477_v43 }
  0x45   :  { %v605_v45 = vld [vmem:[#allocation9 + $0x520] sm:$0xff]  ;;  %723 = vmatpush.msrb.mxu1 %v541_v44 }
  0x46   :  { %v669_v46 = vld [vmem:[#allocation9 + $0x720] sm:$0xff]  ;;  %743 = vmatpush.msrb.mxu2 %v605_v45 }
  0x47   :  { %763 = vmatpush.msrb.mxu3 %v669_v46  ;;  %v473_v47 = vld [vmem:[#allocation9 + $0x100] sm:$0xff] }
  0x48   :  { %v537_v48 = vld [vmem:[#allocation9 + $0x300] sm:$0xff]  ;;  %704 = vmatpush.msrb.mxu0 %v473_v47  ;;  %v498_v47 = vld [vmem:[#allocation9 + $0x1c8] sm:$0xff] }
  0x49   :  { %v601_v49 = vld [vmem:[#allocation9 + $0x500] sm:$0xff]  ;;  %724 = vmatpush.msrb.mxu1 %v537_v48  ;;  %v562_v48 = vld [vmem:[#allocation9 + $0x3c8] sm:$0xff] }
  0x4a   :  { %v665_v50 = vld [vmem:[#allocation9 + $0x700] sm:$0xff]  ;;  %744 = vmatpush.msrb.mxu2 %v601_v49  ;;  %v626_v49 = vld [vmem:[#allocation9 + $0x5c8] sm:$0xff] }
  0x4b   :  { %764 = vmatpush.msrb.mxu3 %v665_v50  ;;  %v469_v51 = vld [vmem:[#allocation9 + $0xe0] sm:$0xff] }
  0x4c   :  { %v533_v52 = vld [vmem:[#allocation9 + $0x2e0] sm:$0xff]  ;;  %705 = vmatpush.msrb.mxu0 %v469_v51 }
  0x4d   :  { %v597_v53 = vld [vmem:[#allocation9 + $0x4e0] sm:$0xff]  ;;  %725 = vmatpush.msrb.mxu1 %v533_v52 }
  0x4e   :  { %v661_v54 = vld [vmem:[#allocation9 + $0x6e0] sm:$0xff]  ;;  %745 = vmatpush.msrb.mxu2 %v597_v53 }
  0x4f   :  { %765 = vmatpush.msrb.mxu3 %v661_v54  ;;  %v465_v55 = vld [vmem:[#allocation9 + $0xc0] sm:$0xff]  ;;  %v690_v54 = vld [vmem:[#allocation9 + $0x7c8] sm:$0xff] }
  0x50   :  { %v529_v56 = vld [vmem:[#allocation9 + $0x2c0] sm:$0xff]  ;;  %706 = vmatpush.msrb.mxu0 %v465_v55 }
  0x51   :  { %v593_v57 = vld [vmem:[#allocation9 + $0x4c0] sm:$0xff]  ;;  %726 = vmatpush.msrb.mxu1 %v529_v56 }
  0x52   :  { %v657_v58 = vld [vmem:[#allocation9 + $0x6c0] sm:$0xff]  ;;  %746 = vmatpush.msrb.mxu2 %v593_v57 }
  0x53   :  { %766 = vmatpush.msrb.mxu3 %v657_v58  ;;  %v461_v59 = vld [vmem:[#allocation9 + $0xa0] sm:$0xff] }
  0x54   :  { %v525_v60 = vld [vmem:[#allocation9 + $0x2a0] sm:$0xff]  ;;  %707 = vmatpush.msrb.mxu0 %v461_v59  ;;  %v494_v59 = vld [vmem:[#allocation9 + $0x1a8] sm:$0xff] }
  0x55   :  { %v589_v61 = vld [vmem:[#allocation9 + $0x4a0] sm:$0xff]  ;;  %727 = vmatpush.msrb.mxu1 %v525_v60  ;;  %v558_v60 = vld [vmem:[#allocation9 + $0x3a8] sm:$0xff] }
  0x56   :  { %v653_v62 = vld [vmem:[#allocation9 + $0x6a0] sm:$0xff]  ;;  %747 = vmatpush.msrb.mxu2 %v589_v61  ;;  %v622_v61 = vld [vmem:[#allocation9 + $0x5a8] sm:$0xff] }
  0x57   :  { %767 = vmatpush.msrb.mxu3 %v653_v62  ;;  %v457_v63 = vld [vmem:[#allocation9 + $0x80] sm:$0xff] }
  0x58   :  { %v521_v0 = vld [vmem:[#allocation9 + $0x280] sm:$0xff]  ;;  %708 = vmatpush.msrb.mxu0 %v457_v63 }
  0x59   :  { %v585_v1 = vld [vmem:[#allocation9 + $0x480] sm:$0xff]  ;;  %728 = vmatpush.msrb.mxu1 %v521_v0 }
  0x5a   :  { %v649_v2 = vld [vmem:[#allocation9 + $0x680] sm:$0xff]  ;;  %748 = vmatpush.msrb.mxu2 %v585_v1 }
  0x5b   :  { %768 = vmatpush.msrb.mxu3 %v649_v2  ;;  %v453_v3 = vld [vmem:[#allocation9 + $0x60] sm:$0xff]  ;;  %v686_v2 = vld [vmem:[#allocation9 + $0x7a8] sm:$0xff] }
  0x5c   :  { %v517_v4 = vld [vmem:[#allocation9 + $0x260] sm:$0xff]  ;;  %709 = vmatpush.msrb.mxu0 %v453_v3 }
  0x5d   :  { %v581_v5 = vld [vmem:[#allocation9 + $0x460] sm:$0xff]  ;;  %729 = vmatpush.msrb.mxu1 %v517_v4 }
  0x5e   :  { %v645_v8 = vld [vmem:[#allocation9 + $0x660] sm:$0xff]  ;;  %749 = vmatpush.msrb.mxu2 %v581_v5 }
  0x5f   :  { %769 = vmatpush.msrb.mxu3 %v645_v8  ;;  %v449_v13 = vld [vmem:[#allocation9 + $0x40] sm:$0xff] }
  0x60   :  { %v513_v14 = vld [vmem:[#allocation9 + $0x240] sm:$0xff]  ;;  %710 = vmatpush.msrb.mxu0 %v449_v13 }
  0x61   :  { %v577_v15 = vld [vmem:[#allocation9 + $0x440] sm:$0xff]  ;;  %730 = vmatpush.msrb.mxu1 %v513_v14 }
  0x62   :  { %v641_v16 = vld [vmem:[#allocation9 + $0x640] sm:$0xff]  ;;  %750 = vmatpush.msrb.mxu2 %v577_v15 }
  0x63   :  { %770 = vmatpush.msrb.mxu3 %v641_v16  ;;  %v445_v21 = vld [vmem:[#allocation9 + $0x20] sm:$0xff]  ;;  %v682_v16 = vld [vmem:[#allocation9 + $0x788] sm:$0xff] }
  0x64   :  { %v509_v22 = vld [vmem:[#allocation9 + $0x220] sm:$0xff]  ;;  %711 = vmatpush.msrb.mxu0 %v445_v21 }
  0x65   :  { %v573_v23 = vld [vmem:[#allocation9 + $0x420] sm:$0xff]  ;;  %731 = vmatpush.msrb.mxu1 %v509_v22 }
  0x66   :  { %v637_v24 = vld [vmem:[#allocation9 + $0x620] sm:$0xff]  ;;  %751 = vmatpush.msrb.mxu2 %v573_v23 }
  0x67   :  { %771 = vmatpush.msrb.mxu3 %v637_v24  ;;  %v441_v29 = vld [vmem:[#allocation9] sm:$0xff] }
  0x68   :  { %v505_v30 = vld [vmem:[#allocation9 + $0x200] sm:$0xff]  ;;  %712 = vmatpush.msrb.mxu0 %v441_v29 }
  0x69   :  { %v569_v31 = vld [vmem:[#allocation9 + $0x400] sm:$0xff]  ;;  %732 = vmatpush.msrb.mxu1 %v505_v30 }
  0x6a   :  { %v633_v32 = vld [vmem:[#allocation9 + $0x600] sm:$0xff]  ;;  %752 = vmatpush.msrb.mxu2 %v569_v31  ;;  %777 = vmatpush.msra.mxu0 %v502_v33  ;;  %v482_v33 = vld [vmem:[#allocation9 + $0x148] sm:$0xff] }
  0x6b   :  { %772 = vmatpush.msrb.mxu3 %v633_v32  ;;  %797 = vmatpush.msra.mxu1 %v566_v34  ;;  %v678_v32 = vld [vmem:[#allocation9 + $0x768] sm:$0xff] }
  0x6c   :  { %817 = vmatpush.msra.mxu2 %v630_v41  ;;  %778 = vmatpush.msra.mxu0 %v498_v47  ;;  %v546_v34 = vld [vmem:[#allocation9 + $0x348] sm:$0xff] }
  0x6d   :  { %837 = vmatpush.msra.mxu3 %v694_v42  ;;  %798 = vmatpush.msra.mxu1 %v562_v48  ;;  %v606_v47 = vld [vmem:[#allocation9 + $0x528] sm:$0xff] }
  0x6e   :  { %818 = vmatpush.msra.mxu2 %v626_v49  ;;  %779 = vmatpush.msra.mxu0 %v494_v59 }
  0x6f   :  { %838 = vmatpush.msra.mxu3 %v690_v54  ;;  %799 = vmatpush.msra.mxu1 %v558_v60 }
  0x70   :  { %819 = vmatpush.msra.mxu2 %v622_v61 }
  0x71   :  { %839 = vmatpush.msra.mxu3 %v686_v2  ;;  %v662_v2 = vld [vmem:[#allocation9 + $0x6e8] sm:$0xff] }
  0x73   :  { %840 = vmatpush.msra.mxu3 %v682_v16  ;;  %v590_v16 = vld [vmem:[#allocation9 + $0x4a8] sm:$0xff] }
  0x75   :  { %841 = vmatpush.msra.mxu3 %v678_v32 }
  0xac   :  { %v1702_v6 = vpop.f32.mrf.mxu0  ;;  %v1704_v7 = vpop.f32.mrf.mxu1 }
  0xad   :  { %v268_v9 = vrot.slane %v1702_v6, 4  ;;  %v296_v10 = vmul.f32 %v1702_v6, %v1702_v6  ;;  %v274_v11 = vrot.slane %v1704_v7, 4  ;;  %v297_v12 = vmul.f32 %v1704_v7, %v1704_v7 }
  0xaf   :  { %v269_v17 = vadd.f32 %v268_v9, %v1702_v6  ;;  %v300_v18 = vrot.slane %v296_v10, 4  ;;  %v275_v19 = vadd.f32 %v274_v11, %v1704_v7  ;;  %v306_v20 = vrot.slane %v297_v12, 4  ;;  %v490_v9 = vld [vmem:[#allocation9 + $0x188] sm:$0xff] }
  0xb0   :  { %v618_v11 = vld [vmem:[#allocation9 + $0x588] sm:$0xff]  ;;  %780 = vmatpush.msra.mxu0 %v490_v9 }
  0xb1   :  { %v270_v25 = vrot.slane %v269_v17, 2  ;;  %v301_v26 = vadd.f32 %v300_v18, %v296_v10  ;;  %v276_v27 = vrot.slane %v275_v19, 2  ;;  %v307_v28 = vadd.f32 %v306_v20, %v297_v12  ;;  %v554_v10 = vld [vmem:[#allocation9 + $0x388] sm:$0xff]  ;;  %820 = vmatpush.msra.mxu2 %v618_v11 }
  0xb2   :  { %800 = vmatpush.msra.mxu1 %v554_v10  ;;  %v658_v10 = vld [vmem:[#allocation9 + $0x6c8] sm:$0xff] }
  0xb3   :  { %v271_v35 = vadd.f32 %v270_v25, %v269_v17  ;;  %v302_v36 = vrot.slane %v301_v26, 2  ;;  %v277_v37 = vadd.f32 %v276_v27, %v275_v19  ;;  %v308_v38 = vrot.slane %v307_v28, 2  ;;  %v1714_v39 = vpop.f32.mrf.mxu2  ;;  %v1716_v40 = vpop.f32.mrf.mxu3  ;;  %v486_v25 = vld [vmem:[#allocation9 + $0x168] sm:$0xff] }
  0xb4   :  { %v280_v43 = vrot.slane %v1714_v39, 4  ;;  %v298_v44 = vmul.f32 %v1714_v39, %v1714_v39  ;;  %v286_v45 = vrot.slane %v1716_v40, 4  ;;  %v299_v46 = vmul.f32 %v1716_v40, %v1716_v40  ;;  %v614_v27 = vld [vmem:[#allocation9 + $0x568] sm:$0xff]  ;;  %781 = vmatpush.msra.mxu0 %v486_v25 }
  0xb5   :  { %v272_v50 = vrot.slane %v271_v35, 1  ;;  %v303_v51 = vadd.f32 %v302_v36, %v301_v26  ;;  %v278_v52 = vrot.slane %v277_v37, 1  ;;  %v309_v53 = vadd.f32 %v308_v38, %v307_v28  ;;  %v550_v26 = vld [vmem:[#allocation9 + $0x368] sm:$0xff]  ;;  %821 = vmatpush.msra.mxu2 %v614_v27 }
  0xb6   :  { %v281_v55 = vadd.f32 %v280_v43, %v1714_v39  ;;  %v312_v56 = vrot.slane %v298_v44, 4  ;;  %v287_v57 = vadd.f32 %v286_v45, %v1716_v40  ;;  %v318_v58 = vrot.slane %v299_v46, 4  ;;  %801 = vmatpush.msra.mxu1 %v550_v26  ;;  %v674_v38 = vld [vmem:[#allocation9 + $0x748] sm:$0xff]  ;;  %782 = vmatpush.msra.mxu0 %v482_v33 }
  0xb7   :  { %v273_v62 = vadd.f32 %v272_v50, %v271_v35  ;;  %v304_v63 = vrot.slane %v303_v51, 1  ;;  %v279_v0 = vadd.f32 %v278_v52, %v277_v37  ;;  %v310_v1 = vrot.slane %v309_v53, 1  ;;  %v610_v37 = vld [vmem:[#allocation9 + $0x548] sm:$0xff]  ;;  %842 = vmatpush.msra.mxu3 %v674_v38 }
  0xb8   :  { %v282_v3 = vrot.slane %v281_v55, 2  ;;  %v313_v4 = vadd.f32 %v312_v56, %v298_v44  ;;  %v288_v5 = vrot.slane %v287_v57, 2  ;;  %v319_v8 = vadd.f32 %v318_v58, %v299_v46  ;;  %802 = vmatpush.msra.mxu1 %v546_v34  ;;  %v478_v45 = vld [vmem:[#allocation9 + $0x128] sm:$0xff]  ;;  %822 = vmatpush.msra.mxu2 %v610_v37 }
  0xb9   :  { %v1726_v12 = vmul.f32 0.125, %v273_v62  ;;  %v305_v13 = vadd.f32 %v304_v63, %v303_v51  ;;  %v1728_v14 = vmul.f32 0.125, %v279_v0  ;;  %v311_v15 = vadd.f32 %v310_v1, %v309_v53  ;;  %v542_v46 = vld [vmem:[#allocation9 + $0x328] sm:$0xff]  ;;  %783 = vmatpush.msra.mxu0 %v478_v45 }
  0xba   :  { %v283_v17 = vadd.f32 %v282_v3, %v281_v55  ;;  %v314_v18 = vrot.slane %v313_v4, 2  ;;  %v289_v19 = vadd.f32 %v288_v5, %v287_v57  ;;  %v320_v20 = vrot.slane %v319_v8, 2  ;;  %v670_v50 = vld [vmem:[#allocation9 + $0x728] sm:$0xff]  ;;  %803 = vmatpush.msra.mxu1 %v542_v46  ;;  %823 = vmatpush.msra.mxu2 %v606_v47 }
  0xbb   :  { %v324_v21 = vmul.f32 0.125, %v305_v13  ;;  %v328_v22 = vmul.f32 %v1726_v12, %v1726_v12  ;;  %v325_v23 = vmul.f32 0.125, %v311_v15  ;;  %v329_v24 = vmul.f32 %v1728_v14, %v1728_v14  ;;  %v474_v55 = vld [vmem:[#allocation9 + $0x108] sm:$0xff]  ;;  %843 = vmatpush.msra.mxu3 %v670_v50 }
  0xbc   :  { %v284_v28 = vrot.slane %v283_v17, 1  ;;  %v315_v29 = vadd.f32 %v314_v18, %v313_v4  ;;  %v290_v30 = vrot.slane %v289_v19, 1  ;;  %v321_v31 = vadd.f32 %v320_v20, %v319_v8  ;;  %v538_v56 = vld [vmem:[#allocation9 + $0x308] sm:$0xff]  ;;  %784 = vmatpush.msra.mxu0 %v474_v55 }
  0xbd   :  { %v332_v35 = vsub.f32 %v324_v21, %v328_v22  ;;  %v333_v36 = vsub.f32 %v325_v23, %v329_v24  ;;  %v602_v57 = vld [vmem:[#allocation9 + $0x508] sm:$0xff]  ;;  %804 = vmatpush.msra.mxu1 %v538_v56 }
  0xbe   :  { %v285_v41 = vadd.f32 %v284_v28, %v283_v17  ;;  %v316_v42 = vrot.slane %v315_v29, 1  ;;  %v291_v43 = vadd.f32 %v290_v30, %v289_v19  ;;  %v322_v44 = vrot.slane %v321_v31, 1  ;;  %v666_v58 = vld [vmem:[#allocation9 + $0x708] sm:$0xff]  ;;  %824 = vmatpush.msra.mxu2 %v602_v57 }
  0xbf   :  { %v1734_v48 = vadd.f32 1e-05, %v332_v35  ;;  %v1736_v49 = vadd.f32 1e-05, %v333_v36  ;;  %v470_v62 = vld [vmem:[#allocation9 + $0xe8] sm:$0xff]  ;;  %844 = vmatpush.msra.mxu3 %v666_v58 }
  0xc0   :  { %v1738_v51 = vmul.f32 0.125, %v285_v41  ;;  %v317_v52 = vadd.f32 %v316_v42, %v315_v29  ;;  %v1740_v53 = vmul.f32 0.125, %v291_v43  ;;  %v323_v54 = vadd.f32 %v322_v44, %v321_v31  ;;  %v534_v63 = vld [vmem:[#allocation9 + $0x2e8] sm:$0xff]  ;;  %785 = vmatpush.msra.mxu0 %v470_v62 }
  0xc1   :  { %1365 = vrsqrt.f32 %v1734_v48  ;;  %v598_v0 = vld [vmem:[#allocation9 + $0x4e8] sm:$0xff]  ;;  %805 = vmatpush.msra.mxu1 %v534_v63  ;;  %845 = vmatpush.msra.mxu3 %v662_v2  ;;  %vm356_vm2 = vweird.f32 %v1736_v49  ;;  %vm346_vm12 = vweird.f32 %v1734_v48 }
  0xc2   :  { %1367 = vrsqrt.f32 %v1736_v49  ;;  %v326_v59 = vmul.f32 0.125, %v317_v52  ;;  %v330_v60 = vmul.f32 %v1738_v51, %v1738_v51  ;;  %v327_v61 = vmul.f32 0.125, %v323_v54  ;;  %v466_v4 = vld [vmem:[#allocation9 + $0xc8] sm:$0xff]  ;;  %825 = vmatpush.msra.mxu2 %v598_v0 }
  0xc3   :  { %v331_v1 = vmul.f32 %v1740_v53, %v1740_v53  ;;  %v530_v5 = vld [vmem:[#allocation9 + $0x2c8] sm:$0xff]  ;;  %786 = vmatpush.msra.mxu0 %v466_v4  ;;  %846 = vmatpush.msra.mxu3 %v658_v10 }
  0xc4   :  { %v334_v3 = vsub.f32 %v326_v59, %v330_v60  ;;  %v594_v8 = vld [vmem:[#allocation9 + $0x4c8] sm:$0xff]  ;;  %806 = vmatpush.msra.mxu1 %v530_v5 }
  0xc5   :  { %v335_v9 = vsub.f32 %v327_v61, %v331_v1  ;;  %v462_v13 = vld [vmem:[#allocation9 + $0xa8] sm:$0xff]  ;;  %826 = vmatpush.msra.mxu2 %v594_v8 }
  0xc6   :  { %v1748_v11 = vadd.f32 1e-05, %v334_v3  ;;  %v526_v15 = vld [vmem:[#allocation9 + $0x2a8] sm:$0xff]  ;;  %787 = vmatpush.msra.mxu0 %v462_v13 }
  0xc7   :  { %v1750_v17 = vpop.eup %1365  ;;  %v1752_v18 = vadd.f32 1e-05, %v335_v9  ;;  %v654_v19 = vld [vmem:[#allocation9 + $0x6a8] sm:$0xff]  ;;  %807 = vmatpush.msra.mxu1 %v526_v15  ;;  %827 = vmatpush.msra.mxu2 %v590_v16 }
  0xc8   :  { %v1754_v20 = vpop.eup %1367  ;;  %v341_v21 = vmul.f32 %v1750_v17, %v1734_v48  ;;  %1369 = vrsqrt.f32 %v1748_v11  ;;  %v458_v22 = vld [vmem:[#allocation9 + $0x88] sm:$0xff]  ;;  %847 = vmatpush.msra.mxu3 %v654_v19  ;;  %vm366_vm6 = vweird.f32 %v1748_v11  ;;  %vm347_vm7 = vweird.f32 %v1750_v17 }
  0xc9   :  { %v522_v23 = vld [vmem:[#allocation9 + $0x288] sm:$0xff]  ;;  %v351_v25 = vmul.f32 %v1754_v20, %v1736_v49  ;;  %1371 = vrsqrt.f32 %v1752_v18  ;;  %788 = vmatpush.msra.mxu0 %v458_v22  ;;  %vm357_vm1 = vweird.f32 %v1754_v20  ;;  %vm376_vm9 = vweird.f32 %v1752_v18  ;;  %vm348_vm14 = vmor %vm346_vm12, %vm347_vm7 }
  0xca   :  { %v586_v24 = vld [vmem:[#allocation9 + $0x488] sm:$0xff]  ;;  %808 = vmatpush.msra.mxu1 %v522_v23  ;;  %v342_v32 = vmul.f32 %v1750_v17, %v341_v21  ;;  %vm358_vm3 = vmor %vm356_vm2, %vm357_vm1 }
  0xcb   :  { %v650_v26 = vld [vmem:[#allocation9 + $0x688] sm:$0xff]  ;;  %v352_v29 = vmul.f32 %v1754_v20, %v351_v25  ;;  %828 = vmatpush.msra.mxu2 %v586_v24 }
  0xcc   :  { %v454_v27 = vld [vmem:[#allocation9 + $0x68] sm:$0xff]  ;;  %848 = vmatpush.msra.mxu3 %v650_v26  ;;  %v343_v54 = vmul.f32 0.5, %v342_v32 }
  0xcd   :  { %v518_v28 = vld [vmem:[#allocation9 + $0x268] sm:$0xff]  ;;  %789 = vmatpush.msra.mxu0 %v454_v27  ;;  %v353_v36 = vmul.f32 0.5, %v352_v29 }
  0xce   :  { %v582_v30 = vld [vmem:[#allocation9 + $0x468] sm:$0xff]  ;;  %809 = vmatpush.msra.mxu1 %v518_v28  ;;  %v1370_v42 = vpop.eup %1369  ;;  %v344_v62 = vsub.f32 1.5, %v343_v54  ;;  %v563_v54 = vld [vmem:[#allocation9 + $0x3d0] sm:$0xff] }
  0xcf   :  { %v646_v31 = vld [vmem:[#allocation9 + $0x668] sm:$0xff]  ;;  %829 = vmatpush.msra.mxu2 %v582_v30  ;;  %v1372_v45 = vpop.eup %1371  ;;  %v354_v46 = vsub.f32 1.5, %v353_v36  ;;  %v361_v47 = vmul.f32 %v1370_v42, %v1748_v11  ;;  %vm367_vm4 = vweird.f32 %v1370_v42  ;;  %v267_v30 = vld [vmem:[#allocation7] sm:$0xf] }
  0xd0   :  { %v450_v33 = vld [vmem:[#allocation9 + $0x48] sm:$0xff]  ;;  %849 = vmatpush.msra.mxu3 %v646_v31  ;;  %v371_v55 = vmul.f32 %v1372_v45, %v1752_v18  ;;  %vm377_vm5 = vweird.f32 %v1372_v45  ;;  %v345_v4 = vmul.f32 %v1750_v17, %v344_v62  ;;  %vm368_vm8 = vmor %vm366_vm6, %vm367_vm4  ;;  %v555_v62 = vld [vmem:[#allocation9 + $0x390] sm:$0xff] }
  0xd1   :  { %v514_v34 = vld [vmem:[#allocation9 + $0x248] sm:$0xff]  ;;  %790 = vmatpush.msra.mxu0 %v450_v33  ;;  %v362_v58 = vmul.f32 %v1370_v42, %v361_v47  ;;  %v355_v59 = vmul.f32 %v1754_v20, %v354_v46  ;;  %vm378_vm10 = vmor %vm376_vm9, %vm377_vm5 }
  0xd2   :  { %v578_v35 = vld [vmem:[#allocation9 + $0x448] sm:$0xff]  ;;  %810 = vmatpush.msra.mxu1 %v514_v34  ;;  %v372_v60 = vmul.f32 %v1372_v45, %v371_v55  ;;  %v349_v15 = vsel %vm348_vm14, %v1750_v17, %v345_v4  ;;  %v627_v55 = vld [vmem:[#allocation9 + $0x5d0] sm:$0xff] }
  0xd3   :  { %v642_v37 = vld [vmem:[#allocation9 + $0x648] sm:$0xff]  ;;  %830 = vmatpush.msra.mxu2 %v578_v35  ;;  %v363_v61 = vmul.f32 0.5, %v362_v58  ;;  %v359_v1 = vsel %vm358_vm3, %v1754_v20, %v355_v59  ;;  %v559_v58 = vld [vmem:[#allocation9 + $0x3b0] sm:$0xff] }
  0xd4   :  { %v446_v38 = vld [vmem:[#allocation9 + $0x28] sm:$0xff]  ;;  %850 = vmatpush.msra.mxu3 %v642_v37  ;;  %v373_v63 = vmul.f32 0.5, %v372_v60  ;;  %v384_v49 = vrot.slane %v359_v1, 7  ;;  %v623_v59 = vld [vmem:[#allocation9 + $0x5b0] sm:$0xff] }
  0xd5   :  { %v510_v41 = vld [vmem:[#allocation9 + $0x228] sm:$0xff]  ;;  %791 = vmatpush.msra.mxu0 %v446_v38  ;;  %v364_v0 = vsub.f32 1.5, %v363_v61  ;;  %v687_v60 = vld [vmem:[#allocation9 + $0x7b0] sm:$0xff] }
  0xd6   :  { %v574_v43 = vld [vmem:[#allocation9 + $0x428] sm:$0xff]  ;;  %811 = vmatpush.msra.mxu1 %v510_v41  ;;  %v374_v2 = vsub.f32 1.5, %v373_v63  ;;  %v388_v16 = vsel %vm387_vm11, %v349_v15, %v384_v49  ;;  %v491_v61 = vld [vmem:[#allocation9 + $0x190] sm:$0xff] }
  0xd7   :  { %v638_v44 = vld [vmem:[#allocation9 + $0x628] sm:$0xff]  ;;  %831 = vmatpush.msra.mxu2 %v574_v43  ;;  %v365_v3 = vmul.f32 %v1370_v42, %v364_v0  ;;  %v619_v63 = vld [vmem:[#allocation9 + $0x590] sm:$0xff] }
  0xd8   :  { %v442_v50 = vld [vmem:[#allocation9 + $0x8] sm:$0xff]  ;;  %851 = vmatpush.msra.mxu3 %v638_v44  ;;  %v375_v5 = vmul.f32 %v1372_v45, %v374_v2  ;;  %v683_v0 = vld [vmem:[#allocation9 + $0x790] sm:$0xff] }
  0xd9   :  { %v506_v52 = vld [vmem:[#allocation9 + $0x208] sm:$0xff]  ;;  %792 = vmatpush.msra.mxu0 %v442_v50  ;;  %v369_v8 = vsel %vm368_vm8, %v1370_v42, %v365_v3  ;;  %v695_v50 = vld [vmem:[#allocation9 + $0x7f0] sm:$0xff] }
  0xda   :  { %v570_v56 = vld [vmem:[#allocation9 + $0x408] sm:$0xff]  ;;  %812 = vmatpush.msra.mxu1 %v506_v52  ;;  %v385_v9 = vrot.slane %v369_v8, 6  ;;  %v379_v10 = vsel %vm378_vm10, %v1372_v45, %v375_v5  ;;  %v499_v52 = vld [vmem:[#allocation9 + $0x1d0] sm:$0xff] }
  0xdb   :  { %v634_v57 = vld [vmem:[#allocation9 + $0x608] sm:$0xff]  ;;  %832 = vmatpush.msra.mxu2 %v570_v56  ;;  %v386_v13 = vrot.slane %v379_v10, 5  ;;  %v691_v56 = vld [vmem:[#allocation9 + $0x7d0] sm:$0xff] }
  0xdc   :  { %852 = vmatpush.msra.mxu3 %v634_v57  ;;  %v266_v11 = vld [vmem:[%s1918_s3] sm:$0xf]  ;;  %v495_v57 = vld [vmem:[#allocation9 + $0x1b0] sm:$0xff] }
  0xdd   :  { %v390_v18 = vsel %vm389_vm13, %v385_v9, %v386_v13  ;;  %v487_v1 = vld [vmem:[#allocation9 + $0x170] sm:$0xff] }
  0xde   :  { %v392_v19 = vsel %vm391_vm15, %v388_v16, %v390_v18  ;;  %v551_v2 = vld [vmem:[#allocation9 + $0x370] sm:$0xff] }
  0xdf   :  { %v394_v20 = vmul.f32 %v392_v19, %v266_v11  ;;  %v615_v3 = vld [vmem:[#allocation9 + $0x570] sm:$0xff] }
  0xe0   :  { %v679_v4 = vld [vmem:[#allocation9 + $0x770] sm:$0xff] }
  0xe1   :  { %v396_v48 = vperm.slane %v394_v20, 0  ;;  %v397_v21 = vperm.slane %v394_v20, 1  ;;  %v398_v22 = vperm.slane %v394_v20, 2  ;;  %v399_v23 = vperm.slane %v394_v20, 3  ;;  %v483_v5 = vld [vmem:[#allocation9 + $0x150] sm:$0xff] }
  0xe2   :  { %v547_v49 = vld [vmem:[#allocation9 + $0x350] sm:$0xff] }
  0xe3   :  { %v405_v24 = vmul.f32 %v397_v21, %v1728_v14  ;;  %v406_v25 = vmul.f32 %v398_v22, %v1738_v51  ;;  %v407_v26 = vmul.f32 %v399_v23, %v1740_v53  ;;  %v404_v27 = vmul.f32 %v396_v48, %v1726_v12  ;;  %v611_v8 = vld [vmem:[#allocation9 + $0x550] sm:$0xff] }
  0xe4   :  { %v423_v35 = vmul.f32 %v399_v23, %v1716_v40  ;;  %v420_v14 = vmul.f32 %v396_v48, %v1702_v6  ;;  %v421_v51 = vmul.f32 %v397_v21, %v1704_v7  ;;  %v422_v53 = vmul.f32 %v398_v22, %v1714_v39  ;;  %v503_v6 = vld [vmem:[#allocation9 + $0x1f0] sm:$0xff] }
  0xe5   :  { %v412_v17 = vrot.slane %v405_v24, 7  ;;  %v413_v28 = vrot.slane %v406_v25, 6  ;;  %v414_v29 = vrot.slane %v407_v26, 5  ;;  %v567_v7 = vld [vmem:[#allocation9 + $0x3f0] sm:$0xff] }
  0xe6   :  { %v631_v39 = vld [vmem:[#allocation9 + $0x5f0] sm:$0xff] }
  0xe7   :  { %v415_v31 = vsel %vm387_vm11, %v404_v27, %v412_v17  ;;  %v416_v32 = vsel %vm389_vm13, %v413_v28, %v414_v29  ;;  %v675_v9 = vld [vmem:[#allocation9 + $0x750] sm:$0xff] }
  0xe8   :  { %v417_v33 = vsel %vm391_vm15, %v415_v31, %v416_v32  ;;  %v479_v10 = vld [vmem:[#allocation9 + $0x130] sm:$0xff] }
  0xe9   :  { %v419_v34 = vsub.f32 %v267_v30, %v417_v33  ;;  %v543_v13 = vld [vmem:[#allocation9 + $0x330] sm:$0xff] }
  0xea   :  { %v607_v11 = vld [vmem:[#allocation9 + $0x530] sm:$0xff] }
  0xeb   :  { %v428_v12 = vperm.slane %v419_v34, 3  ;;  %v425_v36 = vperm.slane %v419_v34, 0  ;;  %v426_v37 = vperm.slane %v419_v34, 1  ;;  %v427_v38 = vperm.slane %v419_v34, 2  ;;  %v671_v15 = vld [vmem:[#allocation9 + $0x730] sm:$0xff] }
  0xec   :  { %v475_v16 = vld [vmem:[#allocation9 + $0x110] sm:$0xff] }
  0xed   :  { %v436_v41 = vadd.f32 %v428_v12, %v423_v35  ;;  %v433_v42 = vadd.f32 %v425_v36, %v420_v14  ;;  %v434_v43 = vadd.f32 %v426_v37, %v421_v51  ;;  %v435_v44 = vadd.f32 %v427_v38, %v422_v53  ;;  %v539_v18 = vld [vmem:[#allocation9 + $0x310] sm:$0xff] }
  0xee   :  { %v603_v19 = vld [vmem:[#allocation9 + $0x510] sm:$0xff] }
  0xef   :  { %v1793_v45 = vmax.f32 %v433_v42, 0.0  ;;  %v1795_v46 = vmax.f32 %v434_v43, 0.0  ;;  %v1797_v47 = vmax.f32 %v435_v44, 0.0  ;;  %v1799_v40 = vmax.f32 %v436_v41, 0.0  ;;  %v667_v20 = vld [vmem:[#allocation9 + $0x710] sm:$0xff] }
  0xf0   :  { %v471_v48 = vld [vmem:[#allocation9 + $0xf0] sm:$0xff] }
  0xf1   :  { %713 = vmatmul.f32.vlgmr.msrb.gmra.mxu0 %v1793_v45  ;;  %733 = vmatmul.f32.vlgmr.msrb.gmra.mxu1 %v1795_v46  ;;  %v535_v21 = vld [vmem:[#allocation9 + $0x2f0] sm:$0xff] }
  0xf2   :  { %753 = vmatmul.f32.vlgmr.msrb.gmra.mxu2 %v1797_v47  ;;  %773 = vmatmul.f32.vlgmr.msrb.gmra.mxu3 %v1799_v40  ;;  %v599_v22 = vld [vmem:[#allocation9 + $0x4f0] sm:$0xff] }
  0xf3   :  { %857 = vmatpush.msrb.mxu0 %v503_v6  ;;  %877 = vmatpush.msrb.mxu1 %v567_v7  ;;  %v663_v23 = vld [vmem:[#allocation9 + $0x6f0] sm:$0xff] }
  0xf4   :  { %897 = vmatpush.msrb.mxu2 %v631_v39  ;;  %917 = vmatpush.msrb.mxu3 %v695_v50  ;;  %v467_v24 = vld [vmem:[#allocation9 + $0xd0] sm:$0xff] }
  0xf5   :  { %858 = vmatpush.msrb.mxu0 %v499_v52  ;;  %878 = vmatpush.msrb.mxu1 %v563_v54  ;;  %v531_v25 = vld [vmem:[#allocation9 + $0x2d0] sm:$0xff]  ;;  %v504_v52 = vld [vmem:[#allocation9 + $0x1f8] sm:$0xff] }
  0xf6   :  { %898 = vmatpush.msrb.mxu2 %v627_v55  ;;  %918 = vmatpush.msrb.mxu3 %v691_v56  ;;  %v595_v26 = vld [vmem:[#allocation9 + $0x4d0] sm:$0xff]  ;;  %v568_v54 = vld [vmem:[#allocation9 + $0x3f8] sm:$0xff] }
  0xf7   :  { %859 = vmatpush.msrb.mxu0 %v495_v57  ;;  %879 = vmatpush.msrb.mxu1 %v559_v58  ;;  %v659_v27 = vld [vmem:[#allocation9 + $0x6d0] sm:$0xff]  ;;  %v632_v55 = vld [vmem:[#allocation9 + $0x5f8] sm:$0xff] }
  0xf8   :  { %899 = vmatpush.msrb.mxu2 %v623_v59  ;;  %919 = vmatpush.msrb.mxu3 %v687_v60  ;;  %v463_v17 = vld [vmem:[#allocation9 + $0xb0] sm:$0xff]  ;;  %v696_v56 = vld [vmem:[#allocation9 + $0x7f8] sm:$0xff] }
  0xf9   :  { %860 = vmatpush.msrb.mxu0 %v491_v61  ;;  %880 = vmatpush.msrb.mxu1 %v555_v62  ;;  %v527_v28 = vld [vmem:[#allocation9 + $0x2b0] sm:$0xff]  ;;  %v500_v57 = vld [vmem:[#allocation9 + $0x1d8] sm:$0xff] }
  0xfa   :  { %900 = vmatpush.msrb.mxu2 %v619_v63  ;;  %920 = vmatpush.msrb.mxu3 %v683_v0  ;;  %v591_v29 = vld [vmem:[#allocation9 + $0x4b0] sm:$0xff]  ;;  %v564_v58 = vld [vmem:[#allocation9 + $0x3d8] sm:$0xff] }
  0xfb   :  { %793 = vmatmul.f32.vlgmr.msra.gmra.mxu0 %v1793_v45  ;;  %813 = vmatmul.f32.vlgmr.msra.gmra.mxu1 %v1795_v46  ;;  %v655_v30 = vld [vmem:[#allocation9 + $0x6b0] sm:$0xff]  ;;  %v628_v59 = vld [vmem:[#allocation9 + $0x5d8] sm:$0xff] }
  0xfc   :  { %833 = vmatmul.f32.vlgmr.msra.gmra.mxu2 %v1797_v47  ;;  %853 = vmatmul.f32.vlgmr.msra.gmra.mxu3 %v1799_v40  ;;  %v459_v31 = vld [vmem:[#allocation9 + $0x90] sm:$0xff]  ;;  %v692_v60 = vld [vmem:[#allocation9 + $0x7d8] sm:$0xff] }
  0xfd   :  { %861 = vmatpush.msrb.mxu0 %v487_v1  ;;  %881 = vmatpush.msrb.mxu1 %v551_v2  ;;  %v523_v32 = vld [vmem:[#allocation9 + $0x290] sm:$0xff]  ;;  %v496_v61 = vld [vmem:[#allocation9 + $0x1b8] sm:$0xff] }
  0xfe   :  { %901 = vmatpush.msrb.mxu2 %v615_v3  ;;  %921 = vmatpush.msrb.mxu3 %v679_v4  ;;  %v587_v33 = vld [vmem:[#allocation9 + $0x490] sm:$0xff]  ;;  %v560_v62 = vld [vmem:[#allocation9 + $0x3b8] sm:$0xff] }
  0xff   :  { %862 = vmatpush.msrb.mxu0 %v483_v5  ;;  %882 = vmatpush.msrb.mxu1 %v547_v49  ;;  %v651_v34 = vld [vmem:[#allocation9 + $0x690] sm:$0xff]  ;;  %v624_v63 = vld [vmem:[#allocation9 + $0x5b8] sm:$0xff] }
 0x100   :  { %902 = vmatpush.msrb.mxu2 %v611_v8  ;;  %922 = vmatpush.msrb.mxu3 %v675_v9  ;;  %v455_v35 = vld [vmem:[#allocation9 + $0x70] sm:$0xff]  ;;  %v688_v0 = vld [vmem:[#allocation9 + $0x7b8] sm:$0xff] }
 0x101   :  { %863 = vmatpush.msrb.mxu0 %v479_v10  ;;  %883 = vmatpush.msrb.mxu1 %v543_v13  ;;  %v519_v14 = vld [vmem:[#allocation9 + $0x270] sm:$0xff]  ;;  %v492_v1 = vld [vmem:[#allocation9 + $0x198] sm:$0xff] }
 0x102   :  { %903 = vmatpush.msrb.mxu2 %v607_v11  ;;  %923 = vmatpush.msrb.mxu3 %v671_v15  ;;  %v583_v51 = vld [vmem:[#allocation9 + $0x470] sm:$0xff]  ;;  %v556_v2 = vld [vmem:[#allocation9 + $0x398] sm:$0xff] }
 0x103   :  { %864 = vmatpush.msrb.mxu0 %v475_v16  ;;  %884 = vmatpush.msrb.mxu1 %v539_v18  ;;  %v647_v53 = vld [vmem:[#allocation9 + $0x670] sm:$0xff]  ;;  %v620_v3 = vld [vmem:[#allocation9 + $0x598] sm:$0xff] }
 0x104   :  { %904 = vmatpush.msrb.mxu2 %v603_v19  ;;  %924 = vmatpush.msrb.mxu3 %v667_v20  ;;  %v451_v12 = vld [vmem:[#allocation9 + $0x50] sm:$0xff]  ;;  %v684_v4 = vld [vmem:[#allocation9 + $0x798] sm:$0xff] }
 0x105   :  { %865 = vmatpush.msrb.mxu0 %v471_v48  ;;  %885 = vmatpush.msrb.mxu1 %v535_v21  ;;  %v515_v36 = vld [vmem:[#allocation9 + $0x250] sm:$0xff]  ;;  %v488_v5 = vld [vmem:[#allocation9 + $0x178] sm:$0xff] }
 0x106   :  { %905 = vmatpush.msrb.mxu2 %v599_v22  ;;  %925 = vmatpush.msrb.mxu3 %v663_v23  ;;  %v579_v37 = vld [vmem:[#allocation9 + $0x450] sm:$0xff]  ;;  %v552_v49 = vld [vmem:[#allocation9 + $0x378] sm:$0xff] }
 0x107   :  { %866 = vmatpush.msrb.mxu0 %v467_v24  ;;  %886 = vmatpush.msrb.mxu1 %v531_v25  ;;  %v643_v38 = vld [vmem:[#allocation9 + $0x650] sm:$0xff]  ;;  %v616_v8 = vld [vmem:[#allocation9 + $0x578] sm:$0xff] }
 0x108   :  { %906 = vmatpush.msrb.mxu2 %v595_v26  ;;  %926 = vmatpush.msrb.mxu3 %v659_v27  ;;  %v447_v41 = vld [vmem:[#allocation9 + $0x30] sm:$0xff]  ;;  %v680_v9 = vld [vmem:[#allocation9 + $0x778] sm:$0xff] }
 0x109   :  { %867 = vmatpush.msrb.mxu0 %v463_v17  ;;  %887 = vmatpush.msrb.mxu1 %v527_v28  ;;  %v511_v42 = vld [vmem:[#allocation9 + $0x230] sm:$0xff]  ;;  %v484_v10 = vld [vmem:[#allocation9 + $0x158] sm:$0xff] }
 0x10a   :  { %907 = vmatpush.msrb.mxu2 %v591_v29  ;;  %927 = vmatpush.msrb.mxu3 %v655_v30  ;;  %v575_v43 = vld [vmem:[#allocation9 + $0x430] sm:$0xff]  ;;  %v548_v13 = vld [vmem:[#allocation9 + $0x358] sm:$0xff] }
 0x10b   :  { %868 = vmatpush.msrb.mxu0 %v459_v31  ;;  %888 = vmatpush.msrb.mxu1 %v523_v32  ;;  %v639_v44 = vld [vmem:[#allocation9 + $0x630] sm:$0xff]  ;;  %v612_v11 = vld [vmem:[#allocation9 + $0x558] sm:$0xff] }
 0x10c   :  { %908 = vmatpush.msrb.mxu2 %v587_v33  ;;  %928 = vmatpush.msrb.mxu3 %v651_v34  ;;  %v443_v6 = vld [vmem:[#allocation9 + $0x10] sm:$0xff]  ;;  %v676_v15 = vld [vmem:[#allocation9 + $0x758] sm:$0xff] }
 0x10d   :  { %869 = vmatpush.msrb.mxu0 %v455_v35  ;;  %889 = vmatpush.msrb.mxu1 %v519_v14  ;;  %v507_v7 = vld [vmem:[#allocation9 + $0x210] sm:$0xff]  ;;  %v480_v16 = vld [vmem:[#allocation9 + $0x138] sm:$0xff] }
 0x10e   :  { %909 = vmatpush.msrb.mxu2 %v583_v51  ;;  %929 = vmatpush.msrb.mxu3 %v647_v53  ;;  %v571_v39 = vld [vmem:[#allocation9 + $0x410] sm:$0xff]  ;;  %v544_v18 = vld [vmem:[#allocation9 + $0x338] sm:$0xff] }
 0x10f   :  { %870 = vmatpush.msrb.mxu0 %v451_v12  ;;  %890 = vmatpush.msrb.mxu1 %v515_v36  ;;  %v635_v50 = vld [vmem:[#allocation9 + $0x610] sm:$0xff]  ;;  %v608_v19 = vld [vmem:[#allocation9 + $0x538] sm:$0xff] }
 0x110   :  { %910 = vmatpush.msrb.mxu2 %v579_v37  ;;  %930 = vmatpush.msrb.mxu3 %v643_v38  ;;  %v672_v20 = vld [vmem:[#allocation9 + $0x738] sm:$0xff] }
 0x111   :  { %871 = vmatpush.msrb.mxu0 %v447_v41  ;;  %891 = vmatpush.msrb.mxu1 %v511_v42  ;;  %v476_v48 = vld [vmem:[#allocation9 + $0x118] sm:$0xff] }
 0x112   :  { %911 = vmatpush.msrb.mxu2 %v575_v43  ;;  %931 = vmatpush.msrb.mxu3 %v639_v44  ;;  %v540_v21 = vld [vmem:[#allocation9 + $0x318] sm:$0xff] }
 0x113   :  { %872 = vmatpush.msrb.mxu0 %v443_v6  ;;  %892 = vmatpush.msrb.mxu1 %v507_v7  ;;  %v604_v22 = vld [vmem:[#allocation9 + $0x518] sm:$0xff] }
 0x114   :  { %912 = vmatpush.msrb.mxu2 %v571_v39  ;;  %932 = vmatpush.msrb.mxu3 %v635_v50  ;;  %v668_v23 = vld [vmem:[#allocation9 + $0x718] sm:$0xff] }
 0x115   :  { %873 = vmatmul.f32.vlgmr.msrb.gmra.mxu0 %v1793_v45  ;;  %893 = vmatmul.f32.vlgmr.msrb.gmra.mxu1 %v1795_v46  ;;  %v472_v24 = vld [vmem:[#allocation9 + $0xf8] sm:$0xff] }
 0x116   :  { %913 = vmatmul.f32.vlgmr.msrb.gmra.mxu2 %v1797_v47  ;;  %933 = vmatmul.f32.vlgmr.msrb.gmra.mxu3 %v1799_v40  ;;  %v536_v25 = vld [vmem:[#allocation9 + $0x2f8] sm:$0xff] }
 0x117   :  { %937 = vmatpush.msra.mxu0 %v504_v52  ;;  %957 = vmatpush.msra.mxu1 %v568_v54  ;;  %v600_v26 = vld [vmem:[#allocation9 + $0x4f8] sm:$0xff] }
 0x118   :  { %977 = vmatpush.msra.mxu2 %v632_v55  ;;  %997 = vmatpush.msra.mxu3 %v696_v56  ;;  %v664_v27 = vld [vmem:[#allocation9 + $0x6f8] sm:$0xff] }
 0x119   :  { %938 = vmatpush.msra.mxu0 %v500_v57  ;;  %958 = vmatpush.msra.mxu1 %v564_v58  ;;  %v468_v17 = vld [vmem:[#allocation9 + $0xd8] sm:$0xff] }
 0x11a   :  { %978 = vmatpush.msra.mxu2 %v628_v59  ;;  %998 = vmatpush.msra.mxu3 %v692_v60  ;;  %v532_v28 = vld [vmem:[#allocation9 + $0x2d8] sm:$0xff] }
 0x11b   :  { %939 = vmatpush.msra.mxu0 %v496_v61  ;;  %959 = vmatpush.msra.mxu1 %v560_v62  ;;  %v596_v29 = vld [vmem:[#allocation9 + $0x4d8] sm:$0xff] }
 0x11c   :  { %979 = vmatpush.msra.mxu2 %v624_v63  ;;  %999 = vmatpush.msra.mxu3 %v688_v0  ;;  %v660_v30 = vld [vmem:[#allocation9 + $0x6d8] sm:$0xff] }
 0x11d   :  { %940 = vmatpush.msra.mxu0 %v492_v1  ;;  %960 = vmatpush.msra.mxu1 %v556_v2  ;;  %v464_v31 = vld [vmem:[#allocation9 + $0xb8] sm:$0xff] }
 0x11e   :  { %980 = vmatpush.msra.mxu2 %v620_v3  ;;  %1000 = vmatpush.msra.mxu3 %v684_v4  ;;  %v528_v32 = vld [vmem:[#allocation9 + $0x2b8] sm:$0xff] }
 0x11f   :  { %941 = vmatpush.msra.mxu0 %v488_v5  ;;  %961 = vmatpush.msra.mxu1 %v552_v49  ;;  %v592_v33 = vld [vmem:[#allocation9 + $0x4b8] sm:$0xff] }
 0x120   :  { %981 = vmatpush.msra.mxu2 %v616_v8  ;;  %1001 = vmatpush.msra.mxu3 %v680_v9  ;;  %v656_v34 = vld [vmem:[#allocation9 + $0x6b8] sm:$0xff] }
 0x121   :  { %942 = vmatpush.msra.mxu0 %v484_v10  ;;  %962 = vmatpush.msra.mxu1 %v548_v13  ;;  %v460_v35 = vld [vmem:[#allocation9 + $0x98] sm:$0xff] }
 0x122   :  { %982 = vmatpush.msra.mxu2 %v612_v11  ;;  %1002 = vmatpush.msra.mxu3 %v676_v15  ;;  %v524_v14 = vld [vmem:[#allocation9 + $0x298] sm:$0xff] }
 0x123   :  { %943 = vmatpush.msra.mxu0 %v480_v16  ;;  %963 = vmatpush.msra.mxu1 %v544_v18  ;;  %v588_v51 = vld [vmem:[#allocation9 + $0x498] sm:$0xff] }
 0x124   :  { %983 = vmatpush.msra.mxu2 %v608_v19  ;;  %1003 = vmatpush.msra.mxu3 %v672_v20  ;;  %v652_v53 = vld [vmem:[#allocation9 + $0x698] sm:$0xff] }
 0x125   :  { %944 = vmatpush.msra.mxu0 %v476_v48  ;;  %964 = vmatpush.msra.mxu1 %v540_v21  ;;  %v456_v12 = vld [vmem:[#allocation9 + $0x78] sm:$0xff] }
 0x126   :  { %984 = vmatpush.msra.mxu2 %v604_v22  ;;  %1004 = vmatpush.msra.mxu3 %v668_v23  ;;  %v520_v36 = vld [vmem:[#allocation9 + $0x278] sm:$0xff] }
 0x127   :  { %945 = vmatpush.msra.mxu0 %v472_v24  ;;  %965 = vmatpush.msra.mxu1 %v536_v25  ;;  %v584_v37 = vld [vmem:[#allocation9 + $0x478] sm:$0xff] }
 0x128   :  { %985 = vmatpush.msra.mxu2 %v600_v26  ;;  %1005 = vmatpush.msra.mxu3 %v664_v27  ;;  %v648_v38 = vld [vmem:[#allocation9 + $0x678] sm:$0xff] }
 0x129   :  { %946 = vmatpush.msra.mxu0 %v468_v17  ;;  %966 = vmatpush.msra.mxu1 %v532_v28  ;;  %v452_v41 = vld [vmem:[#allocation9 + $0x58] sm:$0xff] }
 0x12a   :  { %986 = vmatpush.msra.mxu2 %v596_v29  ;;  %1006 = vmatpush.msra.mxu3 %v660_v30  ;;  %v516_v42 = vld [vmem:[#allocation9 + $0x258] sm:$0xff] }
 0x12b   :  { %947 = vmatpush.msra.mxu0 %v464_v31  ;;  %967 = vmatpush.msra.mxu1 %v528_v32  ;;  %v580_v43 = vld [vmem:[#allocation9 + $0x458] sm:$0xff] }
 0x12c   :  { %987 = vmatpush.msra.mxu2 %v592_v33  ;;  %1007 = vmatpush.msra.mxu3 %v656_v34  ;;  %v644_v44 = vld [vmem:[#allocation9 + $0x658] sm:$0xff] }
 0x12d   :  { %948 = vmatpush.msra.mxu0 %v460_v35  ;;  %968 = vmatpush.msra.mxu1 %v524_v14  ;;  %v448_v6 = vld [vmem:[#allocation9 + $0x38] sm:$0xff] }
 0x12e   :  { %988 = vmatpush.msra.mxu2 %v588_v51  ;;  %1008 = vmatpush.msra.mxu3 %v652_v53  ;;  %v512_v7 = vld [vmem:[#allocation9 + $0x238] sm:$0xff] }
 0x12f   :  { %949 = vmatpush.msra.mxu0 %v456_v12  ;;  %969 = vmatpush.msra.mxu1 %v520_v36  ;;  %v576_v39 = vld [vmem:[#allocation9 + $0x438] sm:$0xff] }
 0x130   :  { %989 = vmatpush.msra.mxu2 %v584_v37  ;;  %1009 = vmatpush.msra.mxu3 %v648_v38  ;;  %v640_v50 = vld [vmem:[#allocation9 + $0x638] sm:$0xff] }
 0x131   :  { %950 = vmatpush.msra.mxu0 %v452_v41  ;;  %970 = vmatpush.msra.mxu1 %v516_v42  ;;  %v444_v52 = vld [vmem:[#allocation9 + $0x18] sm:$0xff] }
 0x132   :  { %990 = vmatpush.msra.mxu2 %v580_v43  ;;  %1010 = vmatpush.msra.mxu3 %v644_v44  ;;  %v508_v54 = vld [vmem:[#allocation9 + $0x218] sm:$0xff] }
 0x133   :  { %951 = vmatpush.msra.mxu0 %v448_v6  ;;  %971 = vmatpush.msra.mxu1 %v512_v7  ;;  %v572_v55 = vld [vmem:[#allocation9 + $0x418] sm:$0xff] }
 0x134   :  { %v636_v56 = vld [vmem:[#allocation9 + $0x618] sm:$0xff]  ;;  %991 = vmatpush.msra.mxu2 %v576_v39  ;;  %1011 = vmatpush.msra.mxu3 %v640_v50 }
 0x135   :  { %952 = vmatpush.msra.mxu0 %v444_v52  ;;  %972 = vmatpush.msra.mxu1 %v508_v54 }
 0x136   :  { %992 = vmatpush.msra.mxu2 %v572_v55  ;;  %1012 = vmatpush.msra.mxu3 %v636_v56 }
 0x137   :  { %953 = vmatmul.f32.vlgmr.msra.gmra.mxu0 %v1793_v45  ;;  %973 = vmatmul.f32.vlgmr.msra.gmra.mxu1 %v1795_v46 }
 0x138   :  { %993 = vmatmul.f32.vlgmr.msra.gmra.mxu2 %v1797_v47  ;;  %1013 = vmatmul.f32.vlgmr.msra.gmra.mxu3 %v1799_v40 }
 0x16e   :  { %v714_v57 = vpop.f32.mrf.mxu0  ;;  %v734_v58 = vpop.f32.mrf.mxu1 }
 0x16f   :  { %v735_v5 = vadd.f32 %v734_v58, %v714_v57 }
 0x175   :  { %v754_v59 = vpop.f32.mrf.mxu2  ;;  %v774_v60 = vpop.f32.mrf.mxu3 }
 0x176   :  { %v755_v49 = vadd.f32 %v754_v59, %v735_v5 }
 0x178   :  { %v794_v61 = vpop.f32.mrf.mxu0  ;;  %v814_v62 = vpop.f32.mrf.mxu1  ;;  %v1824_v11 = vadd.f32 %v774_v60, %v755_v49 }
 0x179   :  { %v815_v0 = vadd.f32 %v814_v62, %v794_v61 }
 0x17a   :  { %v1019_v20 = vrot.slane %v1824_v11, 4  ;;  %v1047_v48 = vmul.f32 %v1824_v11, %v1824_v11 }
 0x17c   :  { %v1020_v25 = vadd.f32 %v1019_v20, %v1824_v11  ;;  %v1051_v26 = vrot.slane %v1047_v48, 4 }
 0x17e   :  { %v1021_v30 = vrot.slane %v1020_v25, 2  ;;  %v1052_v31 = vadd.f32 %v1051_v26, %v1047_v48  ;;  %v1202_v48 = vld [vmem:[#allocation13 + $0x68] sm:$0xff] }
 0x17f   :  { %v834_v63 = vpop.f32.mrf.mxu2  ;;  %v854_v1 = vpop.f32.mrf.mxu3 }
 0x180   :  { %v835_v2 = vadd.f32 %v834_v63, %v815_v0  ;;  %v1022_v14 = vadd.f32 %v1021_v30, %v1020_v25  ;;  %v1053_v51 = vrot.slane %v1052_v31, 2  ;;  %v1249_v30 = vld [vmem:[#allocation13 + $0x1e0] sm:$0xff] }
 0x182   :  { %v1817_v45 = vadd.f32 %v854_v1, %v835_v2  ;;  %v1023_v38 = vrot.slane %v1022_v14, 1  ;;  %v1054_v41 = vadd.f32 %v1053_v51, %v1052_v31  ;;  %v1204_v2 = vld [vmem:[#allocation13 + $0x78] sm:$0xff] }
 0x183   :  { %1257 = vmatpush.msrb.mxu0 %v1204_v2  ;;  %v1212_v2 = vld [vmem:[#allocation13 + $0xb8] sm:$0xff] }
 0x184   :  { %v1025_v9 = vrot.slane %v1817_v45, 4  ;;  %v1048_v10 = vmul.f32 %v1817_v45, %v1817_v45  ;;  %v1024_v7 = vadd.f32 %v1023_v38, %v1022_v14  ;;  %v1055_v39 = vrot.slane %v1054_v41, 1  ;;  %v1248_v14 = vld [vmem:[#allocation13 + $0x1d8] sm:$0xff]  ;;  %v1231_v38 = vld [vmem:[#allocation13 + $0x150] sm:$0xff] }
 0x186   :  { %v1026_v18 = vadd.f32 %v1025_v9, %v1817_v45  ;;  %v1057_v19 = vrot.slane %v1048_v10, 4  ;;  %v1841_v58 = vmul.f32 0.125, %v1024_v7  ;;  %v1056_v59 = vadd.f32 %v1055_v39, %v1054_v41  ;;  %v1203_v9 = vld [vmem:[#allocation13 + $0x70] sm:$0xff]  ;;  %v1214_v7 = vld [vmem:[#allocation13 + $0xc8] sm:$0xff] }
 0x187   :  { %1258 = vmatpush.msrb.mxu0 %v1203_v9  ;;  %v1247_v41 = vld [vmem:[#allocation13 + $0x1d0] sm:$0xff]  ;;  %v1230_v39 = vld [vmem:[#allocation13 + $0x148] sm:$0xff] }
 0x188   :  { %v1027_v23 = vrot.slane %v1026_v18, 2  ;;  %v1058_v24 = vadd.f32 %v1057_v19, %v1048_v10  ;;  %v1075_v49 = vmul.f32 0.125, %v1056_v59  ;;  %v1219_v10 = vld [vmem:[#allocation13 + $0xf0] sm:$0xff]  ;;  %v1213_v59 = vld [vmem:[#allocation13 + $0xc0] sm:$0xff] }
 0x189   :  { %1259 = vmatpush.msrb.mxu0 %v1202_v48  ;;  %v1227_v9 = vld [vmem:[#allocation13 + $0x130] sm:$0xff]  ;;  %v1210_v48 = vld [vmem:[#allocation13 + $0xa8] sm:$0xff] }
 0x18a   :  { %v1028_v28 = vadd.f32 %v1027_v23, %v1026_v18  ;;  %v1059_v29 = vrot.slane %v1058_v24, 2  ;;  %v1250_v23 = vld [vmem:[#allocation13 + $0x1e8] sm:$0xff] }
 0x18c   :  { %v1029_v34 = vrot.slane %v1028_v28, 1  ;;  %v1060_v35 = vadd.f32 %v1059_v29, %v1058_v24  ;;  %v1233_v29 = vld [vmem:[#allocation13 + $0x160] sm:$0xff] }
 0x18e   :  { %v1030_v36 = vadd.f32 %v1029_v34, %v1028_v28  ;;  %v1061_v37 = vrot.slane %v1060_v35, 1  ;;  %v1217_v28 = vld [vmem:[#allocation13 + $0xe0] sm:$0xff]  ;;  %v1216_v34 = vld [vmem:[#allocation13 + $0xd8] sm:$0xff] }
 0x190   :  { %v1835_v44 = vmul.f32 0.125, %v1030_v36  ;;  %v1062_v6 = vadd.f32 %v1061_v37, %v1060_v35  ;;  %v1232_v35 = vld [vmem:[#allocation13 + $0x158] sm:$0xff]  ;;  %v1199_v36 = vld [vmem:[#allocation13 + $0x50] sm:$0xff] }
 0x191   :  { %v1215_v37 = vld [vmem:[#allocation13 + $0xd0] sm:$0xff] }
 0x192   :  { %v874_v3 = vpop.f32.mrf.mxu0  ;;  %v894_v4 = vpop.f32.mrf.mxu1  ;;  %v1076_v56 = vmul.f32 0.125, %v1062_v6  ;;  %v1080_v57 = vmul.f32 %v1835_v44, %v1835_v44  ;;  %v1198_v6 = vld [vmem:[#allocation13 + $0x48] sm:$0xff] }
 0x193   :  { %v895_v46 = vadd.f32 %v894_v4, %v874_v3  ;;  %v1220_v3 = vld [vmem:[#allocation13 + $0xf8] sm:$0xff] }
 0x194   :  { %v1084_v0 = vsub.f32 %v1076_v56, %v1080_v57  ;;  %v1236_v4 = vld [vmem:[#allocation13 + $0x178] sm:$0xff]  ;;  %1277 = vmatpush.msrb.mxu1 %v1220_v3  ;;  %v1197_v57 = vld [vmem:[#allocation13 + $0x40] sm:$0xff] }
 0x195   :  { %1297 = vmatpush.msrb.mxu2 %v1236_v4  ;;  %v1228_v3 = vld [vmem:[#allocation13 + $0x138] sm:$0xff] }
 0x196   :  { %1278 = vmatpush.msrb.mxu1 %v1219_v10  ;;  %v1849_v18 = vadd.f32 1e-05, %v1084_v0 }
 0x198   :  { %1373 = vrsqrt.f32 %v1849_v18  ;;  %vm1107_vm1 = vweird.f32 %v1849_v18 }
 0x199   :  { %v914_v47 = vpop.f32.mrf.mxu2  ;;  %v934_v40 = vpop.f32.mrf.mxu3 }
 0x19a   :  { %v915_v8 = vadd.f32 %v914_v47, %v895_v46  ;;  %v1252_v46 = vld [vmem:[#allocation13 + $0x1f8] sm:$0xff]  ;;  %v1079_v47 = vmul.f32 %v1841_v58, %v1841_v58 }
 0x19b   :  { %1317 = vmatpush.msrb.mxu3 %v1252_v46 }
 0x19c   :  { %v1822_v13 = vadd.f32 %v934_v40, %v915_v8  ;;  %v1083_v24 = vsub.f32 %v1075_v49, %v1079_v47  ;;  %v1195_v47 = vld [vmem:[#allocation13 + $0x30] sm:$0xff] }
 0x19e   :  { %v1031_v15 = vrot.slane %v1822_v13, 4  ;;  %v1049_v16 = vmul.f32 %v1822_v13, %v1822_v13  ;;  %v1858_v51 = vadd.f32 1e-05, %v1083_v24 }
 0x1a0   :  { %v1032_v21 = vadd.f32 %v1031_v15, %v1822_v13  ;;  %v1063_v22 = vrot.slane %v1049_v16, 4  ;;  %v1235_v15 = vld [vmem:[#allocation13 + $0x170] sm:$0xff]  ;;  %vm1097_vm10 = vweird.f32 %v1858_v51 }
 0x1a1   :  { %1298 = vmatpush.msrb.mxu2 %v1235_v15  ;;  %v1243_v15 = vld [vmem:[#allocation13 + $0x1b0] sm:$0xff] }
 0x1a2   :  { %v1033_v27 = vrot.slane %v1032_v21, 2  ;;  %v1064_v17 = vadd.f32 %v1063_v22, %v1049_v16  ;;  %v1251_v16 = vld [vmem:[#allocation13 + $0x1f0] sm:$0xff]  ;;  %v1234_v22 = vld [vmem:[#allocation13 + $0x168] sm:$0xff] }
 0x1a3   :  { %1318 = vmatpush.msrb.mxu3 %v1251_v16  ;;  %1299 = vmatpush.msrb.mxu2 %v1234_v22 }
 0x1a4   :  { %v1034_v32 = vadd.f32 %v1033_v27, %v1032_v21  ;;  %v1065_v33 = vrot.slane %v1064_v17, 2  ;;  %v1218_v21 = vld [vmem:[#allocation13 + $0xe8] sm:$0xff] }
 0x1a5   :  { %1279 = vmatpush.msrb.mxu1 %v1218_v21  ;;  %1319 = vmatpush.msrb.mxu3 %v1250_v23  ;;  %v1226_v21 = vld [vmem:[#allocation13 + $0x128] sm:$0xff] }
 0x1a6   :  { %v1035_v53 = vrot.slane %v1034_v32, 1  ;;  %v1066_v12 = vadd.f32 %v1065_v33, %v1064_v17  ;;  %v1201_v17 = vld [vmem:[#allocation13 + $0x60] sm:$0xff]  ;;  %1300 = vmatpush.msrb.mxu2 %v1233_v29  ;;  %v1200_v33 = vld [vmem:[#allocation13 + $0x58] sm:$0xff]  ;;  %v1242_v23 = vld [vmem:[#allocation13 + $0x1a8] sm:$0xff] }
 0x1a7   :  { %1260 = vmatpush.msrb.mxu0 %v1201_v17  ;;  %1280 = vmatpush.msrb.mxu1 %v1217_v28  ;;  %v1225_v17 = vld [vmem:[#allocation13 + $0x120] sm:$0xff] }
 0x1a8   :  { %v1036_v42 = vadd.f32 %v1035_v53, %v1034_v32  ;;  %v1067_v43 = vrot.slane %v1066_v12, 1  ;;  %1320 = vmatpush.msrb.mxu3 %v1249_v30  ;;  %1301 = vmatpush.msrb.mxu2 %v1232_v35  ;;  %v1241_v30 = vld [vmem:[#allocation13 + $0x1a0] sm:$0xff]  ;;  %v1191_v35 = vld [vmem:[#allocation13 + $0x10] sm:$0xff] }
 0x1a9   :  { %1261 = vmatpush.msrb.mxu0 %v1200_v33  ;;  %1281 = vmatpush.msrb.mxu1 %v1216_v34  ;;  %v1224_v33 = vld [vmem:[#allocation13 + $0x118] sm:$0xff] }
 0x1aa   :  { %v1837_v50 = vmul.f32 0.125, %v1036_v42  ;;  %v1068_v52 = vadd.f32 %v1067_v43, %v1066_v12  ;;  %1321 = vmatpush.msrb.mxu3 %v1248_v14  ;;  %1302 = vmatpush.msrb.mxu2 %v1231_v38  ;;  %v1240_v34 = vld [vmem:[#allocation13 + $0x198] sm:$0xff]  ;;  %v1206_v38 = vld [vmem:[#allocation13 + $0x88] sm:$0xff] }
 0x1ab   :  { %1262 = vmatpush.msrb.mxu0 %v1199_v36  ;;  %1282 = vmatpush.msrb.mxu1 %v1215_v37  ;;  %v1239_v36 = vld [vmem:[#allocation13 + $0x190] sm:$0xff]  ;;  %v1190_v37 = vld [vmem:[#allocation13 + $0x8] sm:$0xff] }
 0x1ac   :  { %v1077_v60 = vmul.f32 0.125, %v1068_v52  ;;  %v1081_v61 = vmul.f32 %v1837_v50, %v1837_v50  ;;  %1322 = vmatpush.msrb.mxu3 %v1247_v41  ;;  %v1246_v52 = vld [vmem:[#allocation13 + $0x1c8] sm:$0xff]  ;;  %1303 = vmatpush.msrb.mxu2 %v1230_v39  ;;  %v1205_v39 = vld [vmem:[#allocation13 + $0x80] sm:$0xff] }
 0x1ad   :  { %1263 = vmatpush.msrb.mxu0 %v1198_v6  ;;  %1283 = vmatpush.msrb.mxu1 %v1214_v7  ;;  %v1238_v6 = vld [vmem:[#allocation13 + $0x188] sm:$0xff]  ;;  %v1189_v7 = vld [vmem:[#allocation13] sm:$0xff] }
 0x1ae   :  { %v1085_v8 = vsub.f32 %v1077_v60, %v1081_v61  ;;  %1323 = vmatpush.msrb.mxu3 %v1246_v52  ;;  %v1229_v60 = vld [vmem:[#allocation13 + $0x140] sm:$0xff] }
 0x1af   :  { %1264 = vmatpush.msrb.mxu0 %v1197_v57  ;;  %1284 = vmatpush.msrb.mxu1 %v1213_v59  ;;  %v1245_v61 = vld [vmem:[#allocation13 + $0x1c0] sm:$0xff] }
 0x1b0   :  { %v1854_v25 = vadd.f32 1e-05, %v1085_v8  ;;  %1304 = vmatpush.msrb.mxu2 %v1229_v60  ;;  %1324 = vmatpush.msrb.mxu3 %v1245_v61  ;;  %v1211_v8 = vld [vmem:[#allocation13 + $0xb0] sm:$0xff] }
 0x1b1   :  { %1285 = vmatpush.msrb.mxu1 %v1212_v2 }
 0x1b2   :  { %1375 = vrsqrt.f32 %v1854_v25  ;;  %1305 = vmatpush.msrb.mxu2 %v1228_v3  ;;  %vm1117_vm4 = vweird.f32 %v1854_v25 }
 0x1b3   :  { %1377 = vrsqrt.f32 %v1858_v51  ;;  %1286 = vmatpush.msrb.mxu1 %v1211_v8 }
 0x1b4   :  { %v954_v54 = vpop.f32.mrf.mxu0  ;;  %v974_v55 = vpop.f32.mrf.mxu1  ;;  %1306 = vmatpush.msrb.mxu2 %v1227_v9 }
 0x1b5   :  { %v975_v62 = vadd.f32 %v974_v55, %v954_v54  ;;  %v1861_v54 = vpop.eup %1373  ;;  %1287 = vmatpush.msrb.mxu1 %v1210_v48 }
 0x1b6   :  { %v1102_v4 = vmul.f32 %v1861_v54, %v1849_v18  ;;  %1307 = vmatpush.msrb.mxu2 %v1226_v21  ;;  %vm1108_vm0 = vweird.f32 %v1861_v54 }
 0x1b7   :  { %vm1109_vm3 = vmor %vm1107_vm1, %vm1108_vm0 }
 0x1b8   :  { %v1103_v22 = vmul.f32 %v1861_v54, %v1102_v4  ;;  %1308 = vmatpush.msrb.mxu2 %v1225_v17 }
 0x1ba   :  { %v1104_v14 = vmul.f32 0.5, %v1103_v22  ;;  %1309 = vmatpush.msrb.mxu2 %v1224_v33 }
 0x1bb   :  { %v994_v63 = vpop.f32.mrf.mxu2  ;;  %v1014_v5 = vpop.f32.mrf.mxu3 }
 0x1bc   :  { %v995_v1 = vadd.f32 %v994_v63, %v975_v62  ;;  %v1864_v62 = vpop.eup %1375  ;;  %v1105_v52 = vsub.f32 1.5, %v1104_v14 }
 0x1bd   :  { %v1112_v10 = vmul.f32 %v1864_v62, %v1854_v25  ;;  %v1874_v16 = vpop.eup %1377  ;;  %vm1118_vm2 = vweird.f32 %v1864_v62 }
 0x1be   :  { %v1847_v40 = vadd.f32 %v1014_v5, %v995_v1  ;;  %v1196_v1 = vld [vmem:[#allocation13 + $0x38] sm:$0xff]  ;;  %v1092_v28 = vmul.f32 %v1874_v16, %v1858_v51  ;;  %vm1098_vm6 = vweird.f32 %v1874_v16  ;;  %vm1119_vm7 = vmor %vm1117_vm4, %vm1118_vm2 }
 0x1bf   :  { %1265 = vmatpush.msrb.mxu0 %v1196_v1  ;;  %v1244_v5 = vld [vmem:[#allocation13 + $0x1b8] sm:$0xff]  ;;  %v1113_v29 = vmul.f32 %v1864_v62, %v1112_v10  ;;  %vm1099_vm12 = vmor %vm1097_vm10, %vm1098_vm6 }
 0x1c0   :  { %v1037_v19 = vrot.slane %v1847_v40, 4  ;;  %v1050_v20 = vmul.f32 %v1847_v40, %v1847_v40  ;;  %1325 = vmatpush.msrb.mxu3 %v1244_v5  ;;  %v1093_v41 = vmul.f32 %v1874_v16, %v1092_v28  ;;  %v1017_v10 = vld [vmem:[#allocation10] sm:$0xf] }
 0x1c1   :  { %1266 = vmatpush.msrb.mxu0 %v1195_v47 }
 0x1c2   :  { %v1038_v26 = vadd.f32 %v1037_v19, %v1847_v40  ;;  %v1069_v27 = vrot.slane %v1050_v20, 4  ;;  %1326 = vmatpush.msrb.mxu3 %v1243_v15  ;;  %v1094_v59 = vmul.f32 0.5, %v1093_v41 }
 0x1c4   :  { %v1039_v31 = vrot.slane %v1038_v26, 2  ;;  %v1070_v32 = vadd.f32 %v1069_v27, %v1050_v20  ;;  %v1194_v20 = vld [vmem:[#allocation13 + $0x28] sm:$0xff]  ;;  %1327 = vmatpush.msrb.mxu3 %v1242_v23  ;;  %v1209_v27 = vld [vmem:[#allocation13 + $0xa0] sm:$0xff]  ;;  %v1095_v2 = vsub.f32 1.5, %v1094_v59 }
 0x1c5   :  { %1267 = vmatpush.msrb.mxu0 %v1194_v20  ;;  %1288 = vmatpush.msrb.mxu1 %v1209_v27 }
 0x1c6   :  { %v1040_v53 = vadd.f32 %v1039_v31, %v1038_v26  ;;  %v1071_v12 = vrot.slane %v1070_v32, 2  ;;  %v1193_v26 = vld [vmem:[#allocation13 + $0x20] sm:$0xff]  ;;  %v1192_v31 = vld [vmem:[#allocation13 + $0x18] sm:$0xff]  ;;  %1328 = vmatpush.msrb.mxu3 %v1241_v30 }
 0x1c7   :  { %1268 = vmatpush.msrb.mxu0 %v1193_v26 }
 0x1c8   :  { %v1041_v42 = vrot.slane %v1040_v53, 1  ;;  %v1072_v43 = vadd.f32 %v1071_v12, %v1070_v32  ;;  %v1208_v32 = vld [vmem:[#allocation13 + $0x98] sm:$0xff]  ;;  %v1223_v12 = vld [vmem:[#allocation13 + $0x110] sm:$0xff]  ;;  %1329 = vmatpush.msrb.mxu3 %v1240_v34 }
 0x1c9   :  { %1269 = vmatpush.msrb.mxu0 %v1192_v31  ;;  %1289 = vmatpush.msrb.mxu1 %v1208_v32  ;;  %v1018_v31 = vld [vmem:[#allocation12] sm:$0xf] }
 0x1ca   :  { %v1042_v55 = vadd.f32 %v1041_v42, %v1040_v53  ;;  %v1073_v56 = vrot.slane %v1072_v43, 1  ;;  %v1207_v53 = vld [vmem:[#allocation13 + $0x90] sm:$0xff]  ;;  %v1114_v42 = vmul.f32 0.5, %v1113_v29  ;;  %1310 = vmatpush.msrb.mxu2 %v1223_v12  ;;  %1330 = vmatpush.msrb.mxu3 %v1239_v36 }
 0x1cb   :  { %1270 = vmatpush.msrb.mxu0 %v1191_v35  ;;  %1290 = vmatpush.msrb.mxu1 %v1207_v53 }
 0x1cc   :  { %v1866_v63 = vmul.f32 0.125, %v1042_v55  ;;  %v1074_v0 = vadd.f32 %v1073_v56, %v1072_v43  ;;  %v1222_v43 = vld [vmem:[#allocation13 + $0x108] sm:$0xff]  ;;  %v1221_v55 = vld [vmem:[#allocation13 + $0x100] sm:$0xff]  ;;  %1331 = vmatpush.msrb.mxu3 %v1238_v6  ;;  %v1115_v60 = vsub.f32 1.5, %v1114_v42 }
 0x1cd   :  { %1271 = vmatpush.msrb.mxu0 %v1190_v37  ;;  %1291 = vmatpush.msrb.mxu1 %v1206_v38  ;;  %v1237_v56 = vld [vmem:[#allocation13 + $0x180] sm:$0xff] }
 0x1ce   :  { %v1078_v46 = vmul.f32 0.125, %v1074_v0  ;;  %v1082_v49 = vmul.f32 %v1866_v63, %v1866_v63  ;;  %1311 = vmatpush.msrb.mxu2 %v1222_v43  ;;  %1332 = vmatpush.msrb.mxu3 %v1237_v56  ;;  %v1106_v0 = vmul.f32 %v1861_v54, %v1105_v52  ;;  %v1116_v3 = vmul.f32 %v1864_v62, %v1115_v60 }
 0x1cf   :  { %1272 = vmatpush.msrb.mxu0 %v1189_v7  ;;  %1292 = vmatpush.msrb.mxu1 %v1205_v39 }
 0x1d0   :  { %v1086_v19 = vsub.f32 %v1078_v46, %v1082_v49  ;;  %1312 = vmatpush.msrb.mxu2 %v1221_v55  ;;  %v1110_v5 = vsel %vm1109_vm3, %v1861_v54, %v1106_v0  ;;  %v1096_v49 = vmul.f32 %v1874_v16, %v1095_v2  ;;  %v1120_v18 = vsel %vm1119_vm7, %v1864_v62, %v1116_v3 }
 0x1d1   :  { %v1135_v8 = vrot.slane %v1110_v5, 7  ;;  %v1136_v54 = vrot.slane %v1120_v18, 6 }
 0x1d2   :  { %v1877_v24 = vadd.f32 1e-05, %v1086_v19  ;;  %v1100_v15 = vsel %vm1099_vm12, %v1874_v16, %v1096_v49 }
 0x1d3   :  { %v1138_v19 = vsel %vm387_vm11, %v1100_v15, %v1135_v8 }
 0x1d4   :  { %1379 = vrsqrt.f32 %v1877_v24  ;;  %vm1127_vm8 = vweird.f32 %v1877_v24 }
 0x1da   :  { %v1380_v57 = vpop.eup %1379 }
 0x1db   :  { %v1122_v61 = vmul.f32 %v1380_v57, %v1877_v24  ;;  %vm1128_vm5 = vweird.f32 %v1380_v57 }
 0x1dc   :  { %vm1129_vm9 = vmor %vm1127_vm8, %vm1128_vm5 }
 0x1dd   :  { %v1123_v1 = vmul.f32 %v1380_v57, %v1122_v61 }
 0x1df   :  { %v1124_v4 = vmul.f32 0.5, %v1123_v1 }
 0x1e1   :  { %v1125_v46 = vsub.f32 1.5, %v1124_v4 }
 0x1e3   :  { %v1126_v47 = vmul.f32 %v1380_v57, %v1125_v46 }
 0x1e5   :  { %v1130_v9 = vsel %vm1129_vm9, %v1380_v57, %v1126_v47 }
 0x1e6   :  { %v1137_v25 = vrot.slane %v1130_v9, 5 }
 0x1e8   :  { %v1139_v20 = vsel %vm389_vm13, %v1136_v54, %v1137_v25 }
 0x1e9   :  { %v1140_v62 = vsel %vm391_vm15, %v1138_v19, %v1139_v20 }
 0x1ea   :  { %v1142_v48 = vmul.f32 %v1140_v62, %v1017_v10 }
 0x1ec   :  { %v1146_v21 = vperm.slane %v1142_v48, 2  ;;  %v1147_v22 = vperm.slane %v1142_v48, 3  ;;  %v1145_v23 = vperm.slane %v1142_v48, 1  ;;  %v1144_v24 = vperm.slane %v1142_v48, 0 }
 0x1ee   :  { %v1154_v51 = vmul.f32 %v1146_v21, %v1837_v50  ;;  %v1155_v26 = vmul.f32 %v1147_v22, %v1866_v63  ;;  %v1153_v27 = vmul.f32 %v1145_v23, %v1835_v44  ;;  %v1152_v16 = vmul.f32 %v1144_v24, %v1841_v58 }
 0x1ef   :  { %v1171_v35 = vmul.f32 %v1147_v22, %v1847_v40  ;;  %v1168_v50 = vmul.f32 %v1144_v24, %v1824_v11  ;;  %v1169_v63 = vmul.f32 %v1145_v23, %v1817_v45  ;;  %v1170_v44 = vmul.f32 %v1146_v21, %v1822_v13  ;;  %v1364_v11 = vld [vmem:[#allocation15] ss:$0 sm:$0xff] }
 0x1f0   :  { %v1161_v17 = vrot.slane %v1154_v51, 6  ;;  %v1162_v28 = vrot.slane %v1155_v26, 5  ;;  %v1160_v29 = vrot.slane %v1153_v27, 7 }
 0x1f2   :  { %v1164_v30 = vsel %vm389_vm13, %v1161_v17, %v1162_v28  ;;  %v1163_v32 = vsel %vm387_vm11, %v1152_v16, %v1160_v29 }
 0x1f3   :  { %v1165_v33 = vsel %vm391_vm15, %v1163_v32, %v1164_v30 }
 0x1f4   :  { %v1167_v34 = vsub.f32 %v1018_v31, %v1165_v33 }
 0x1f6   :  { %v1173_v14 = vperm.slane %v1167_v34, 0  ;;  %v1174_v53 = vperm.slane %v1167_v34, 1  ;;  %v1175_v58 = vperm.slane %v1167_v34, 2  ;;  %v1176_v12 = vperm.slane %v1167_v34, 3 }
 0x1f8   :  { %v1181_v36 = vadd.f32 %v1173_v14, %v1168_v50  ;;  %v1182_v37 = vadd.f32 %v1174_v53, %v1169_v63  ;;  %v1183_v38 = vadd.f32 %v1175_v58, %v1170_v44  ;;  %v1184_v41 = vadd.f32 %v1176_v12, %v1171_v35 }
 0x1fa   :  { %v1185_v42 = vmax.f32 %v1181_v36, 0.0  ;;  %v1186_v43 = vmax.f32 %v1182_v37, 0.0  ;;  %v1187_v6 = vmax.f32 %v1183_v38, 0.0  ;;  %v1188_v7 = vmax.f32 %v1184_v41, 0.0 }
 0x1fc   :  { %1273 = vmatmul.f32.vlgmr.msrb.gmra.mxu0 %v1185_v42  ;;  %1293 = vmatmul.f32.vlgmr.msrb.gmra.mxu1 %v1186_v43 }
 0x1fd   :  { %1313 = vmatmul.f32.vlgmr.msrb.gmra.mxu2 %v1187_v6  ;;  %1333 = vmatmul.f32.vlgmr.msrb.gmra.mxu3 %v1188_v7 }
 0x279   :  { %v1274_v45 = vpop.f32.mrf.mxu0  ;;  %v1294_v13 = vpop.f32.mrf.mxu1 }
 0x27a   :  { %v1275_v40 = vadd.f32 %v1364_v11, %v1274_v45 }
 0x27c   :  { %v1295_v39 = vadd.f32 %v1294_v13, %v1275_v40 }
 0x280   :  { %v1314_v52 = vpop.f32.mrf.mxu2  ;;  %v1334_v56 = vpop.f32.mrf.mxu3 }
 0x281   :  { %v1315_v55 = vadd.f32 %v1314_v52, %v1295_v39 }
 0x283   :  { %v1335_v57 = vadd.f32 %v1334_v56, %v1315_v55 }
 0x285   :  { %1337 = vst [vmem:[%s1925_s10] sm:$0xff] %v1335_v57 }
 0x286   :  { %1342 = vsyncpa [#allocation3], 1 }
 0x287   :  { %1343 = vsyncpa [#allocation5], 1 }
 0x288   :  { %1344 = vsyncpa [#allocation8], 1 }
 0x289   :  { %1345 = vsyncpa [#allocation11], 1 }
 0x28a   :  { %1346 = vsyncpa [#allocation14], 1 }

</bundles_post_ra>
